<compile_context>
chip_gen: v7x
topology: tpu7x:2x2x1
jax: 0.10.0
libtpu: 0.0.40
codegen_flags: <defaults>
</compile_context>

<pallas_src>
import functools

import jax
import jax.numpy as jnp
from jax.experimental import pallas as pl
from jax.experimental.pallas import tpu as pltpu

BN_EPS = 1e-5
LEAKY_SLOPE = 0.2
LANE = 128
SUBLANE = 8


def _round_up(x, m):
    return (x + m - 1) // m * m


def _leaky_relu(x):
    return jnp.where(x > 0, x, LEAKY_SLOPE * x)


def _pad2(a, rows, cols):
    out = jnp.zeros((rows, cols), jnp.float32)
    return out.at[:a.shape[0], :a.shape[1]].set(a)


# ----------------------------------------------------------------------------
# The single fused kernel (one grid step, all layer loops unrolled, all weights
# VMEM-resident).
# ----------------------------------------------------------------------------
def _make_vae_kernel(n_layers_enc, n_layers_dec, d_half):
    def kernel(x0_ref, adj_ref, w1_ref, b1_ref, w2_ref, b2_ref,
               pool_ref, wh_ref, bh_ref, wd_ref, bd_ref,
               wlast_ref, blast_ref, gnoise_ref, triu_ref, out_ref):
        f32 = jnp.float32

        # --- GIN encoder: unrolled GINConv layers. A' = A + I (self term folded),
        #     eval BatchNorm folded into W2/b2, dropout identity in eval. ---
        h = x0_ref[...]
        for l in range(n_layers_enc):
            agg = jnp.dot(adj_ref[...], h, preferred_element_type=f32)
            t = _leaky_relu(
                jnp.dot(agg, w1_ref[l], preferred_element_type=f32) + b1_ref[l])
            h = _leaky_relu(
                jnp.dot(t, w2_ref[l], preferred_element_type=f32) + b2_ref[l])

        # --- global_add_pool -> BN(eval) -> GIN.fc -> VAE.fc_mu, folded into wh/bh.
        #     Padded graph rows carry bias-only junk; they are sliced off outside. ---
        pooled = jnp.dot(pool_ref[...], h, preferred_element_type=f32)
        z = jnp.dot(pooled, wh_ref[...], preferred_element_type=f32) + bh_ref[...]

        # --- decoder MLP (ReLU on all but the last layer) ---
        for l in range(n_layers_dec - 1):
            z = jnp.maximum(
                jnp.dot(z, wd_ref[l], preferred_element_type=f32) + bd_ref[l], 0.0)
        y = jnp.dot(z, wlast_ref[...], preferred_element_type=f32) + blast_ref[...]

        # --- gumbel_softmax(tau=1, hard=True)[:, :, 0]:
        #     class-split layout -> edge = (l0 + g0 >= l1 + g1) ---
        s = y + gnoise_ref[...]
        edge = (s[:, :d_half] >= s[:, d_half:]).astype(f32)

        # --- upper-triangular scatter expressed as a constant 0/1 matmul ---
        out_ref[...] = jnp.dot(edge, triu_ref[...], preferred_element_type=f32)

    return kernel


def vae_fused_call(x_pad, adj, pool, gnoise, enc, dec):
    n_pad, feat = x_pad.shape
    g_pad = pool.shape[0]
    l_enc = enc["w1"].shape[0]
    l_dec_hidden = dec["wd"].shape[0]
    n_layers_dec = l_dec_hidden + 1
    d = dec["wd"].shape[1]
    nn2_pad = dec["triu"].shape[1]

    def full(shape):
        return pl.BlockSpec(shape, lambda i, _s=len(shape): (0,) * _s)

    grid_spec = pltpu.PrefetchScalarGridSpec(
        num_scalar_prefetch=0,
        grid=(1,),
        in_specs=[
            full((n_pad, feat)),            # x0
            full((n_pad, n_pad)),           # A + I
            full((l_enc, feat, feat)),      # W1 (stacked)
            full((l_enc, 1, feat)),         # b1
            full((l_enc, feat, feat)),      # W2' (BN folded)
            full((l_enc, 1, feat)),         # b2'
            full((g_pad, n_pad)),           # pooling matrix
            full((feat, d)),                # head fold (BN+fc+fc_mu)
            full((1, d)),
            full((l_dec_hidden, d, d)),     # decoder hidden layers
            full((l_dec_hidden, 1, d)),
            full((d, 2 * d)),               # decoder last layer, class-split
            full((1, 2 * d)),
            full((g_pad, 2 * d)),           # gumbel noise
            full((d, nn2_pad)),             # triu 0/1 matrix
        ],
        out_specs=full((g_pad, nn2_pad)),
    )
    return pl.pallas_call(
        _make_vae_kernel(l_enc, n_layers_dec, d),
        out_shape=jax.ShapeDtypeStruct((g_pad, nn2_pad), jnp.float32),
        grid_spec=grid_spec,
        compiler_params=pltpu.CompilerParams(
            dimension_semantics=("arbitrary",),
            vmem_limit_bytes=32 * 1024 * 1024),
    )(x_pad, adj, enc["w1"], enc["b1"], enc["w2"], enc["b2"],
      pool, enc["wh"], enc["bh"], dec["wd"], dec["bd"],
      dec["wlast"], dec["blast"], gnoise, dec["triu"])


# ----------------------------------------------------------------------------
# Parameter construction (deterministic, synthetic) + one-time fold/pad prep
# ----------------------------------------------------------------------------
def init_raw_params(key, input_dim, hidden_enc, latent_dim, n_layers_enc,
                    hidden_dec, n_layers_dec, n_max_nodes):
    def lin(k, din, dout):
        k1, k2 = jax.random.split(k)
        return (jax.random.normal(k1, (din, dout), jnp.float32) * 0.1,
                jax.random.normal(k2, (dout,), jnp.float32) * 0.1)

    def bn(k, d):
        k1, k2, k3, k4 = jax.random.split(k, 4)
        return {"gamma": 1.0 + 0.1 * jax.random.normal(k1, (d,), jnp.float32),
                "beta": 0.1 * jax.random.normal(k2, (d,), jnp.float32),
                "mean": 0.1 * jax.random.normal(k3, (d,), jnp.float32),
                "var": 1.0 + 0.1 * jnp.abs(jax.random.normal(k4, (d,), jnp.float32))}

    params = {"convs": [], "head": {}, "dec": []}
    in_d = input_dim
    for _ in range(n_layers_enc):
        key, k1, k2, k3 = jax.random.split(key, 4)
        w1, b1 = lin(k1, in_d, hidden_enc)
        w2, b2 = lin(k2, hidden_enc, hidden_enc)
        params["convs"].append({"w1": w1, "b1": b1, "bn": bn(k3, hidden_enc),
                                "w2": w2, "b2": b2})
        in_d = hidden_enc

    key, k1, k2, k3 = jax.random.split(key, 4)
    wf, bf = lin(k1, hidden_enc, hidden_enc)     # GIN.fc (GIN latent == hidden_enc)
    wmu, bmu = lin(k2, hidden_enc, latent_dim)   # VAE.fc_mu
    params["head"] = {"bn": bn(k3, hidden_enc), "wf": wf, "bf": bf,
                      "wmu": wmu, "bmu": bmu}

    n_pairs = n_max_nodes * (n_max_nodes - 1) // 2
    dims_in = [latent_dim] + [hidden_dec] * (n_layers_dec - 1)
    dims_out = [hidden_dec] * (n_layers_dec - 1) + [2 * n_pairs]
    for din, dout in zip(dims_in, dims_out):
        key, k = jax.random.split(key)
        w, b = lin(k, din, dout)
        params["dec"].append({"w": w, "b": b})
    return params


def prepare_params(raw, input_dim, hidden_enc, latent_dim, hidden_dec,
                   n_layers_dec, n_max_nodes):
    """Fold eval-mode BatchNorms / the fc->fc_mu chain, pad to lane width, and
    build the class-split last decoder layer + the constant triu matmul matrix."""
    feat = _round_up(max(input_dim, hidden_enc), LANE)
    n_pairs = n_max_nodes * (n_max_nodes - 1) // 2
    d = _round_up(max(latent_dim, hidden_dec, n_pairs), LANE)
    nn2_pad = _round_up(n_max_nodes * n_max_nodes, LANE)

    # Conv MLP is Linear -> LeakyReLU -> BatchNorm -> Linear -> LeakyReLU,
    # so the (eval) BN acts on the INPUT of the second Linear and folds as
    #   W2' = diag(s) @ W2, b2' = t @ W2 + b2   with BN(x) = s*x + t.
    w1s, b1s, w2s, b2s = [], [], [], []
    for layer in raw["convs"]:
        b = layer["bn"]
        s = b["gamma"] * jax.lax.rsqrt(b["var"] + BN_EPS)
        t = b["beta"] - b["mean"] * s
        w2_eff = s[:, None] * layer["w2"]
        b2_eff = t @ layer["w2"] + layer["b2"]
        w1s.append(_pad2(layer["w1"], feat, feat))
        b1s.append(_pad2(layer["b1"][None, :], 1, feat))
        w2s.append(_pad2(w2_eff, feat, feat))
        b2s.append(_pad2(b2_eff[None, :], 1, feat))

    # Head: global_add_pool -> BN(eval) -> GIN.fc -> VAE.fc_mu (no activation
    # between fc and fc_mu), all folded into one (wh, bh).
    h = raw["head"]
    b = h["bn"]
    s = b["gamma"] * jax.lax.rsqrt(b["var"] + BN_EPS)
    t = b["beta"] - b["mean"] * s
    wf_eff = s[:, None] * h["wf"]
    bf_eff = t @ h["wf"] + h["bf"]
    wh = wf_eff @ h["wmu"]
    bh = bf_eff @ h["wmu"] + h["bmu"]

    enc = {"w1": jnp.stack(w1s), "b1": jnp.stack(b1s),
           "w2": jnp.stack(w2s), "b2": jnp.stack(b2s),
           "wh": _pad2(wh, feat, d), "bh": _pad2(bh[None, :], 1, d)}

    # Decoder hidden layers (ReLU'd).
    wds, bds = [], []
    for layer in raw["dec"][:-1]:
        wds.append(_pad2(layer["w"], d, d))
        bds.append(_pad2(layer["b"][None, :], 1, d))

    # Last decoder layer: columns are interleaved (pair0 class0, pair0 class1, ...).
    # Permute offline into [class0 | class1] blocks of width d so the gumbel hard
    # pick is a lane-aligned compare inside the kernel.
    w_last = raw["dec"][-1]["w"]
    b_last = raw["dec"][-1]["b"]
    wlast = jnp.concatenate([_pad2(w_last[:, 0::2], d, d),
                             _pad2(w_last[:, 1::2], d, d)], axis=1)
    blast = jnp.concatenate([_pad2(b_last[0::2][None, :], 1, d),
                             _pad2(b_last[1::2][None, :], 1, d)], axis=1)

    # Upper-triangular scatter as a constant 0/1 matrix: adj_flat = edge @ M.
    iu, ju = jnp.triu_indices(n_max_nodes, k=1)
    flat = iu * n_max_nodes + ju                                   # [n_pairs]
    triu_m = (flat[:, None] == jnp.arange(nn2_pad)[None, :]).astype(jnp.float32)
    triu_m = jnp.pad(triu_m, ((0, d - n_pairs), (0, 0)))           # [d, nn2_pad]

    dec = {"wd": jnp.stack(wds), "bd": jnp.stack(bds),
           "wlast": wlast, "blast": blast, "triu": triu_m}
    return enc, dec


# ----------------------------------------------------------------------------
# Full VAE forward: tiny scatter-free glue in JAX, hot path in one fused kernel.
# ----------------------------------------------------------------------------
@functools.partial(jax.jit, static_argnames=("n_nodes", "n_graphs", "n_max_nodes"))
def vae_forward(enc, dec, x, edge_index, batch, gumbel_key,
                n_nodes, n_graphs, n_max_nodes):
    feat = enc["w1"].shape[1]
    d = dec["wd"].shape[1]
    n_pad = _round_up(n_nodes, SUBLANE)                   # node axis: sublane pad only
    g_pad = _round_up(max(n_graphs, SUBLANE), SUBLANE)

    # Dense adjacency via one-hot matmul (no scatter); GINConv eps=0 self term
    # folded in as +I so the kernel computes a single A'@h.
    src, dst = edge_index[0], edge_index[1]
    node_ids = jnp.arange(n_pad, dtype=edge_index.dtype)
    oh_src = (src[:, None] == node_ids[None, :]).astype(jnp.float32)   # [E, n_pad]
    oh_dst = (dst[:, None] == node_ids[None, :]).astype(jnp.float32)
    adj = (jnp.dot(oh_dst.T, oh_src, preferred_element_type=jnp.float32)
           + jnp.eye(n_pad, dtype=jnp.float32))

    # One-hot pooling matrix P[g, n] = (batch[n] == g), via compare (no scatter).
    batch_pad = jnp.pad(batch, (0, n_pad - n_nodes), constant_values=-1)
    pool = (jnp.arange(g_pad, dtype=batch.dtype)[:, None]
            == batch_pad[None, :]).astype(jnp.float32)

    x_pad = jnp.pad(x, ((0, n_pad - n_nodes), (0, feat - x.shape[1])))

    # Gumbel noise for gumbel_softmax(tau=1, hard=True), class-split layout.
    gnoise = jax.random.gumbel(gumbel_key, (g_pad, 2 * d), jnp.float32)

    # Fused encoder + decoder + gumbel hard pick + triu matmul.
    adjflat = vae_fused_call(x_pad, adj, pool, gnoise, enc, dec)  # [g_pad, nn2_pad]

    adj_up = adjflat[:n_graphs, :n_max_nodes * n_max_nodes].reshape(
        n_graphs, n_max_nodes, n_max_nodes)
    return adj_up + jnp.swapaxes(adj_up, 1, 2)


if __name__ == "__main__":
    # small shapes consistent with the module
    input_dim, hidden_enc, latent_dim, n_layers_enc = 8, 32, 16, 2
    hidden_dec, n_layers_dec, n_max_nodes = 32, 3, 8
    n_nodes, n_graphs, n_edges = 16, 2, 40

    key = jax.random.PRNGKey(0)
    key, kx, ke, kp, kg = jax.random.split(key, 5)

    x = jax.random.normal(kx, (n_nodes, input_dim), jnp.float32)
    edge_index = jax.random.randint(ke, (2, n_edges), 0, n_nodes, jnp.int32)
    # batch assignment: first half of nodes -> graph 0, second half -> graph 1
    batch = jnp.concatenate([jnp.zeros(n_nodes // 2, jnp.int32),
                             jnp.ones(n_nodes - n_nodes // 2, jnp.int32)])

    raw = init_raw_params(kp, input_dim, hidden_enc, latent_dim, n_layers_enc,
                          hidden_dec, n_layers_dec, n_max_nodes)
    enc, dec = prepare_params(raw, input_dim, hidden_enc, latent_dim,
                              hidden_dec, n_layers_dec, n_max_nodes)

    adj = vae_forward(enc, dec, x, edge_index, batch, kg,
                      n_nodes=n_nodes, n_graphs=n_graphs, n_max_nodes=n_max_nodes)
    adj = jax.block_until_ready(adj)

    assert adj.shape == (n_graphs, n_max_nodes, n_max_nodes)
    assert bool(jnp.all(jnp.isfinite(adj)))
    assert bool(jnp.all(adj == jnp.swapaxes(adj, 1, 2)))
    assert bool(jnp.all((adj == 0.0) | (adj == 1.0)))
    print("KERNEL_OK")
</pallas_src>

<mosaic_0001>
module attributes {stable_mosaic.version = 11 : i64} {
  func.func @kernel(%arg0: i32, %arg1: memref<16x128xf32, #tpu.memory_space<vmem>>, %arg2: memref<16x16xf32, #tpu.memory_space<vmem>>, %arg3: memref<2x128x128xf32, #tpu.memory_space<vmem>>, %arg4: memref<2x1x128xf32, #tpu.memory_space<vmem>>, %arg5: memref<2x128x128xf32, #tpu.memory_space<vmem>>, %arg6: memref<2x1x128xf32, #tpu.memory_space<vmem>>, %arg7: memref<8x16xf32, #tpu.memory_space<vmem>>, %arg8: memref<128x128xf32, #tpu.memory_space<vmem>>, %arg9: memref<1x128xf32, #tpu.memory_space<vmem>>, %arg10: memref<2x128x128xf32, #tpu.memory_space<vmem>>, %arg11: memref<2x1x128xf32, #tpu.memory_space<vmem>>, %arg12: memref<128x256xf32, #tpu.memory_space<vmem>>, %arg13: memref<1x256xf32, #tpu.memory_space<vmem>>, %arg14: memref<8x256xf32, #tpu.memory_space<vmem>>, %arg15: memref<128x128xf32, #tpu.memory_space<vmem>>, %arg16: memref<8x128xf32, #tpu.memory_space<vmem>>) attributes {dimension_semantics = [#tpu.dimension_semantics<arbitrary>], iteration_bounds = array<i64: 1>, scalar_prefetch = 0 : i64, scratch_operands = 0 : i64, tpu.core_type = #tpu.core_type<tc>, window_params = [{pipeline_mode = #tpu.pipeline_mode<synchronous>, transform_indices = @transform_0, window_bounds = array<i64: 16, 128>}, {pipeline_mode = #tpu.pipeline_mode<synchronous>, transform_indices = @transform_1, window_bounds = array<i64: 16, 16>}, {pipeline_mode = #tpu.pipeline_mode<synchronous>, transform_indices = @transform_2, window_bounds = array<i64: 2, 128, 128>}, {pipeline_mode = #tpu.pipeline_mode<synchronous>, transform_indices = @transform_3, window_bounds = array<i64: 2, 1, 128>}, {pipeline_mode = #tpu.pipeline_mode<synchronous>, transform_indices = @transform_4, window_bounds = array<i64: 2, 128, 128>}, {pipeline_mode = #tpu.pipeline_mode<synchronous>, transform_indices = @transform_5, window_bounds = array<i64: 2, 1, 128>}, {pipeline_mode = #tpu.pipeline_mode<synchronous>, transform_indices = @transform_6, window_bounds = array<i64: 8, 16>}, {pipeline_mode = #tpu.pipeline_mode<synchronous>, transform_indices = @transform_7, window_bounds = array<i64: 128, 128>}, {pipeline_mode = #tpu.pipeline_mode<synchronous>, transform_indices = @transform_8, window_bounds = array<i64: 1, 128>}, {pipeline_mode = #tpu.pipeline_mode<synchronous>, transform_indices = @transform_9, window_bounds = array<i64: 2, 128, 128>}, {pipeline_mode = #tpu.pipeline_mode<synchronous>, transform_indices = @transform_10, window_bounds = array<i64: 2, 1, 128>}, {pipeline_mode = #tpu.pipeline_mode<synchronous>, transform_indices = @transform_11, window_bounds = array<i64: 128, 256>}, {pipeline_mode = #tpu.pipeline_mode<synchronous>, transform_indices = @transform_12, window_bounds = array<i64: 1, 256>}, {pipeline_mode = #tpu.pipeline_mode<synchronous>, transform_indices = @transform_13, window_bounds = array<i64: 8, 256>}, {pipeline_mode = #tpu.pipeline_mode<synchronous>, transform_indices = @transform_14, window_bounds = array<i64: 128, 128>}, {pipeline_mode = #tpu.pipeline_mode<synchronous>, transform_indices = @transform_15, window_bounds = array<i64: 8, 128>}]} {
    %c0 = arith.constant 0 : index
    %c0_0 = arith.constant 0 : index
    %0 = vector.load %arg1[%c0, %c0_0] : memref<16x128xf32, #tpu.memory_space<vmem>>, vector<16x128xf32>
    %c0_1 = arith.constant 0 : index
    %c0_2 = arith.constant 0 : index
    %1 = vector.load %arg2[%c0_1, %c0_2] : memref<16x16xf32, #tpu.memory_space<vmem>>, vector<16x16xf32>
    %cst = arith.constant dense<0.000000e+00> : vector<16x128xf32>
    %2 = tpu.matmul %1, %0, %cst {dimension_numbers = #tpu.dot_dimension_numbers<[1], [0], [0], [1], [0, 0, 1, 1], [], []>} : vector<16x16xf32>, vector<16x128xf32>, vector<16x128xf32> -> vector<16x128xf32>
    %c0_3 = arith.constant 0 : index
    %c0_4 = arith.constant 0 : index
    %c0_5 = arith.constant 0 : index
    %3 = vector.load %arg3[%c0_3, %c0_4, %c0_5] : memref<2x128x128xf32, #tpu.memory_space<vmem>>, vector<1x128x128xf32>
    %4 = vector.shape_cast %3 : vector<1x128x128xf32> to vector<128x128xf32>
    %cst_6 = arith.constant dense<0.000000e+00> : vector<16x128xf32>
    %5 = tpu.matmul %2, %4, %cst_6 {dimension_numbers = #tpu.dot_dimension_numbers<[1], [0], [0], [1], [0, 0, 1, 1], [], []>} : vector<16x128xf32>, vector<128x128xf32>, vector<16x128xf32> -> vector<16x128xf32>
    %c0_7 = arith.constant 0 : index
    %c0_8 = arith.constant 0 : index
    %c0_9 = arith.constant 0 : index
    %6 = vector.load %arg4[%c0_7, %c0_8, %c0_9] : memref<2x1x128xf32, #tpu.memory_space<vmem>>, vector<1x1x128xf32>
    %7 = vector.shape_cast %6 : vector<1x1x128xf32> to vector<1x128xf32>
    %8 = vector.broadcast %7 : vector<1x128xf32> to vector<16x128xf32>
    %9 = arith.addf %5, %8 : vector<16x128xf32>
    %cst_10 = arith.constant 0.000000e+00 : f32
    %10 = vector.broadcast %cst_10 : f32 to vector<16x128xf32>
    %11 = arith.cmpf ogt, %9, %10 : vector<16x128xf32>
    %cst_11 = arith.constant 2.000000e-01 : f32
    %12 = vector.broadcast %cst_11 : f32 to vector<16x128xf32>
    %13 = arith.mulf %12, %9 : vector<16x128xf32>
    %14 = arith.select %11, %9, %13 : vector<16x128xi1>, vector<16x128xf32>
    %c0_12 = arith.constant 0 : index
    %c0_13 = arith.constant 0 : index
    %c0_14 = arith.constant 0 : index
    %15 = vector.load %arg5[%c0_12, %c0_13, %c0_14] : memref<2x128x128xf32, #tpu.memory_space<vmem>>, vector<1x128x128xf32>
    %16 = vector.shape_cast %15 : vector<1x128x128xf32> to vector<128x128xf32>
    %cst_15 = arith.constant dense<0.000000e+00> : vector<16x128xf32>
    %17 = tpu.matmul %14, %16, %cst_15 {dimension_numbers = #tpu.dot_dimension_numbers<[1], [0], [0], [1], [0, 0, 1, 1], [], []>} : vector<16x128xf32>, vector<128x128xf32>, vector<16x128xf32> -> vector<16x128xf32>
    %c0_16 = arith.constant 0 : index
    %c0_17 = arith.constant 0 : index
    %c0_18 = arith.constant 0 : index
    %18 = vector.load %arg6[%c0_16, %c0_17, %c0_18] : memref<2x1x128xf32, #tpu.memory_space<vmem>>, vector<1x1x128xf32>
    %19 = vector.shape_cast %18 : vector<1x1x128xf32> to vector<1x128xf32>
    %20 = vector.broadcast %19 : vector<1x128xf32> to vector<16x128xf32>
    %21 = arith.addf %17, %20 : vector<16x128xf32>
    %cst_19 = arith.constant 0.000000e+00 : f32
    %22 = vector.broadcast %cst_19 : f32 to vector<16x128xf32>
    %23 = arith.cmpf ogt, %21, %22 : vector<16x128xf32>
    %cst_20 = arith.constant 2.000000e-01 : f32
    %24 = vector.broadcast %cst_20 : f32 to vector<16x128xf32>
    %25 = arith.mulf %24, %21 : vector<16x128xf32>
    %26 = arith.select %23, %21, %25 : vector<16x128xi1>, vector<16x128xf32>
    %c0_21 = arith.constant 0 : index
    %c0_22 = arith.constant 0 : index
    %27 = vector.load %arg2[%c0_21, %c0_22] : memref<16x16xf32, #tpu.memory_space<vmem>>, vector<16x16xf32>
    %cst_23 = arith.constant dense<0.000000e+00> : vector<16x128xf32>
    %28 = tpu.matmul %27, %26, %cst_23 {dimension_numbers = #tpu.dot_dimension_numbers<[1], [0], [0], [1], [0, 0, 1, 1], [], []>} : vector<16x16xf32>, vector<16x128xf32>, vector<16x128xf32> -> vector<16x128xf32>
    %c1 = arith.constant 1 : index
    %c0_24 = arith.constant 0 : index
    %c0_25 = arith.constant 0 : index
    %29 = vector.load %arg3[%c1, %c0_24, %c0_25] : memref<2x128x128xf32, #tpu.memory_space<vmem>>, vector<1x128x128xf32>
    %30 = vector.shape_cast %29 : vector<1x128x128xf32> to vector<128x128xf32>
    %cst_26 = arith.constant dense<0.000000e+00> : vector<16x128xf32>
    %31 = tpu.matmul %28, %30, %cst_26 {dimension_numbers = #tpu.dot_dimension_numbers<[1], [0], [0], [1], [0, 0, 1, 1], [], []>} : vector<16x128xf32>, vector<128x128xf32>, vector<16x128xf32> -> vector<16x128xf32>
    %c1_27 = arith.constant 1 : index
    %c0_28 = arith.constant 0 : index
    %c0_29 = arith.constant 0 : index
    %32 = vector.load %arg4[%c1_27, %c0_28, %c0_29] : memref<2x1x128xf32, #tpu.memory_space<vmem>>, vector<1x1x128xf32>
    %33 = vector.shape_cast %32 : vector<1x1x128xf32> to vector<1x128xf32>
    %34 = vector.broadcast %33 : vector<1x128xf32> to vector<16x128xf32>
    %35 = arith.addf %31, %34 : vector<16x128xf32>
    %cst_30 = arith.constant 0.000000e+00 : f32
    %36 = vector.broadcast %cst_30 : f32 to vector<16x128xf32>
    %37 = arith.cmpf ogt, %35, %36 : vector<16x128xf32>
    %cst_31 = arith.constant 2.000000e-01 : f32
    %38 = vector.broadcast %cst_31 : f32 to vector<16x128xf32>
    %39 = arith.mulf %38, %35 : vector<16x128xf32>
    %40 = arith.select %37, %35, %39 : vector<16x128xi1>, vector<16x128xf32>
    %c1_32 = arith.constant 1 : index
    %c0_33 = arith.constant 0 : index
    %c0_34 = arith.constant 0 : index
    %41 = vector.load %arg5[%c1_32, %c0_33, %c0_34] : memref<2x128x128xf32, #tpu.memory_space<vmem>>, vector<1x128x128xf32>
    %42 = vector.shape_cast %41 : vector<1x128x128xf32> to vector<128x128xf32>
    %cst_35 = arith.constant dense<0.000000e+00> : vector<16x128xf32>
    %43 = tpu.matmul %40, %42, %cst_35 {dimension_numbers = #tpu.dot_dimension_numbers<[1], [0], [0], [1], [0, 0, 1, 1], [], []>} : vector<16x128xf32>, vector<128x128xf32>, vector<16x128xf32> -> vector<16x128xf32>
    %c1_36 = arith.constant 1 : index
    %c0_37 = arith.constant 0 : index
    %c0_38 = arith.constant 0 : index
    %44 = vector.load %arg6[%c1_36, %c0_37, %c0_38] : memref<2x1x128xf32, #tpu.memory_space<vmem>>, vector<1x1x128xf32>
    %45 = vector.shape_cast %44 : vector<1x1x128xf32> to vector<1x128xf32>
    %46 = vector.broadcast %45 : vector<1x128xf32> to vector<16x128xf32>
    %47 = arith.addf %43, %46 : vector<16x128xf32>
    %cst_39 = arith.constant 0.000000e+00 : f32
    %48 = vector.broadcast %cst_39 : f32 to vector<16x128xf32>
    %49 = arith.cmpf ogt, %47, %48 : vector<16x128xf32>
    %cst_40 = arith.constant 2.000000e-01 : f32
    %50 = vector.broadcast %cst_40 : f32 to vector<16x128xf32>
    %51 = arith.mulf %50, %47 : vector<16x128xf32>
    %52 = arith.select %49, %47, %51 : vector<16x128xi1>, vector<16x128xf32>
    %c0_41 = arith.constant 0 : index
    %c0_42 = arith.constant 0 : index
    %53 = vector.load %arg7[%c0_41, %c0_42] : memref<8x16xf32, #tpu.memory_space<vmem>>, vector<8x16xf32>
    %cst_43 = arith.constant dense<0.000000e+00> : vector<8x128xf32>
    %54 = tpu.matmul %53, %52, %cst_43 {dimension_numbers = #tpu.dot_dimension_numbers<[1], [0], [0], [1], [0, 0, 1, 1], [], []>} : vector<8x16xf32>, vector<16x128xf32>, vector<8x128xf32> -> vector<8x128xf32>
    %c0_44 = arith.constant 0 : index
    %c0_45 = arith.constant 0 : index
    %55 = vector.load %arg8[%c0_44, %c0_45] : memref<128x128xf32, #tpu.memory_space<vmem>>, vector<128x128xf32>
    %cst_46 = arith.constant dense<0.000000e+00> : vector<8x128xf32>
    %56 = tpu.matmul %54, %55, %cst_46 {dimension_numbers = #tpu.dot_dimension_numbers<[1], [0], [0], [1], [0, 0, 1, 1], [], []>} : vector<8x128xf32>, vector<128x128xf32>, vector<8x128xf32> -> vector<8x128xf32>
    %c0_47 = arith.constant 0 : index
    %c0_48 = arith.constant 0 : index
    %57 = vector.load %arg9[%c0_47, %c0_48] : memref<1x128xf32, #tpu.memory_space<vmem>>, vector<1x128xf32>
    %58 = vector.broadcast %57 : vector<1x128xf32> to vector<8x128xf32>
    %59 = arith.addf %56, %58 : vector<8x128xf32>
    %c0_49 = arith.constant 0 : index
    %c0_50 = arith.constant 0 : index
    %c0_51 = arith.constant 0 : index
    %60 = vector.load %arg10[%c0_49, %c0_50, %c0_51] : memref<2x128x128xf32, #tpu.memory_space<vmem>>, vector<1x128x128xf32>
    %61 = vector.shape_cast %60 : vector<1x128x128xf32> to vector<128x128xf32>
    %cst_52 = arith.constant dense<0.000000e+00> : vector<8x128xf32>
    %62 = tpu.matmul %59, %61, %cst_52 {dimension_numbers = #tpu.dot_dimension_numbers<[1], [0], [0], [1], [0, 0, 1, 1], [], []>} : vector<8x128xf32>, vector<128x128xf32>, vector<8x128xf32> -> vector<8x128xf32>
    %c0_53 = arith.constant 0 : index
    %c0_54 = arith.constant 0 : index
    %c0_55 = arith.constant 0 : index
    %63 = vector.load %arg11[%c0_53, %c0_54, %c0_55] : memref<2x1x128xf32, #tpu.memory_space<vmem>>, vector<1x1x128xf32>
    %64 = vector.shape_cast %63 : vector<1x1x128xf32> to vector<1x128xf32>
    %65 = vector.broadcast %64 : vector<1x128xf32> to vector<8x128xf32>
    %66 = arith.addf %62, %65 : vector<8x128xf32>
    %cst_56 = arith.constant 0.000000e+00 : f32
    %67 = vector.broadcast %cst_56 : f32 to vector<8x128xf32>
    %68 = arith.maximumf %66, %67 : vector<8x128xf32>
    %c1_57 = arith.constant 1 : index
    %c0_58 = arith.constant 0 : index
    %c0_59 = arith.constant 0 : index
    %69 = vector.load %arg10[%c1_57, %c0_58, %c0_59] : memref<2x128x128xf32, #tpu.memory_space<vmem>>, vector<1x128x128xf32>
    %70 = vector.shape_cast %69 : vector<1x128x128xf32> to vector<128x128xf32>
    %cst_60 = arith.constant dense<0.000000e+00> : vector<8x128xf32>
    %71 = tpu.matmul %68, %70, %cst_60 {dimension_numbers = #tpu.dot_dimension_numbers<[1], [0], [0], [1], [0, 0, 1, 1], [], []>} : vector<8x128xf32>, vector<128x128xf32>, vector<8x128xf32> -> vector<8x128xf32>
    %c1_61 = arith.constant 1 : index
    %c0_62 = arith.constant 0 : index
    %c0_63 = arith.constant 0 : index
    %72 = vector.load %arg11[%c1_61, %c0_62, %c0_63] : memref<2x1x128xf32, #tpu.memory_space<vmem>>, vector<1x1x128xf32>
    %73 = vector.shape_cast %72 : vector<1x1x128xf32> to vector<1x128xf32>
    %74 = vector.broadcast %73 : vector<1x128xf32> to vector<8x128xf32>
    %75 = arith.addf %71, %74 : vector<8x128xf32>
    %cst_64 = arith.constant 0.000000e+00 : f32
    %76 = vector.broadcast %cst_64 : f32 to vector<8x128xf32>
    %77 = arith.maximumf %75, %76 : vector<8x128xf32>
    %c0_65 = arith.constant 0 : index
    %c0_66 = arith.constant 0 : index
    %78 = vector.load %arg12[%c0_65, %c0_66] : memref<128x256xf32, #tpu.memory_space<vmem>>, vector<128x256xf32>
    %cst_67 = arith.constant dense<0.000000e+00> : vector<8x256xf32>
    %79 = tpu.matmul %77, %78, %cst_67 {dimension_numbers = #tpu.dot_dimension_numbers<[1], [0], [0], [1], [0, 0, 1, 1], [], []>} : vector<8x128xf32>, vector<128x256xf32>, vector<8x256xf32> -> vector<8x256xf32>
    %c0_68 = arith.constant 0 : index
    %c0_69 = arith.constant 0 : index
    %80 = vector.load %arg13[%c0_68, %c0_69] : memref<1x256xf32, #tpu.memory_space<vmem>>, vector<1x256xf32>
    %81 = vector.broadcast %80 : vector<1x256xf32> to vector<8x256xf32>
    %82 = arith.addf %79, %81 : vector<8x256xf32>
    %c0_70 = arith.constant 0 : index
    %c0_71 = arith.constant 0 : index
    %83 = vector.load %arg14[%c0_70, %c0_71] : memref<8x256xf32, #tpu.memory_space<vmem>>, vector<8x256xf32>
    %84 = arith.addf %82, %83 : vector<8x256xf32>
    %85 = vector.extract_strided_slice %84 {offsets = [0, 0], sizes = [8, 128], strides = [1, 1]} : vector<8x256xf32> to vector<8x128xf32>
    %86 = vector.extract_strided_slice %84 {offsets = [0, 128], sizes = [8, 128], strides = [1, 1]} : vector<8x256xf32> to vector<8x128xf32>
    %87 = arith.cmpf oge, %85, %86 : vector<8x128xf32>
    %88 = arith.extui %87 : vector<8x128xi1> to vector<8x128xi32>
    %89 = arith.sitofp %88 : vector<8x128xi32> to vector<8x128xf32>
    %c0_72 = arith.constant 0 : index
    %c0_73 = arith.constant 0 : index
    %90 = vector.load %arg15[%c0_72, %c0_73] : memref<128x128xf32, #tpu.memory_space<vmem>>, vector<128x128xf32>
    %cst_74 = arith.constant dense<0.000000e+00> : vector<8x128xf32>
    %91 = tpu.matmul %89, %90, %cst_74 {dimension_numbers = #tpu.dot_dimension_numbers<[1], [0], [0], [1], [0, 0, 1, 1], [], []>} : vector<8x128xf32>, vector<128x128xf32>, vector<8x128xf32> -> vector<8x128xf32>
    %c0_75 = arith.constant 0 : index
    %c0_76 = arith.constant 0 : index
    %92 = vector.load %arg16[%c0_75, %c0_76] : memref<8x128xf32, #tpu.memory_space<vmem>>, vector<8x128xf32>
    tpu.vector_store %arg16[%c0_75, %c0_76], %91 {strides = array<i32>} : memref<8x128xf32, #tpu.memory_space<vmem>>, vector<8x128xf32>,
    return
  }
  func.func @transform_0(%arg0: i32) -> (i32, i32) {
    %c0_i32 = arith.constant 0 : i32
    %c0_i32_0 = arith.constant 0 : i32
    %c0_i32_1 = arith.constant 0 : i32
    return %c0_i32, %c0_i32_0 : i32, i32
  }
  func.func @transform_1(%arg0: i32) -> (i32, i32) {
    %c0_i32 = arith.constant 0 : i32
    %c0_i32_0 = arith.constant 0 : i32
    %c0_i32_1 = arith.constant 0 : i32
    return %c0_i32, %c0_i32_0 : i32, i32
  }
  func.func @transform_2(%arg0: i32) -> (i32, i32, i32) {
    %c0_i32 = arith.constant 0 : i32
    %c0_i32_0 = arith.constant 0 : i32
    %c0_i32_1 = arith.constant 0 : i32
    %c0_i32_2 = arith.constant 0 : i32
    return %c0_i32, %c0_i32_0, %c0_i32_1 : i32, i32, i32
  }
  func.func @transform_3(%arg0: i32) -> (i32, i32, i32) {
    %c0_i32 = arith.constant 0 : i32
    %c0_i32_0 = arith.constant 0 : i32
    %c0_i32_1 = arith.constant 0 : i32
    %c0_i32_2 = arith.constant 0 : i32
    return %c0_i32, %c0_i32_0, %c0_i32_1 : i32, i32, i32
  }
  func.func @transform_4(%arg0: i32) -> (i32, i32, i32) {
    %c0_i32 = arith.constant 0 : i32
    %c0_i32_0 = arith.constant 0 : i32
    %c0_i32_1 = arith.constant 0 : i32
    %c0_i32_2 = arith.constant 0 : i32
    return %c0_i32, %c0_i32_0, %c0_i32_1 : i32, i32, i32
  }
  func.func @transform_5(%arg0: i32) -> (i32, i32, i32) {
    %c0_i32 = arith.constant 0 : i32
    %c0_i32_0 = arith.constant 0 : i32
    %c0_i32_1 = arith.constant 0 : i32
    %c0_i32_2 = arith.constant 0 : i32
    return %c0_i32, %c0_i32_0, %c0_i32_1 : i32, i32, i32
  }
  func.func @transform_6(%arg0: i32) -> (i32, i32) {
    %c0_i32 = arith.constant 0 : i32
    %c0_i32_0 = arith.constant 0 : i32
    %c0_i32_1 = arith.constant 0 : i32
    return %c0_i32, %c0_i32_0 : i32, i32
  }
  func.func @transform_7(%arg0: i32) -> (i32, i32) {
    %c0_i32 = arith.constant 0 : i32
    %c0_i32_0 = arith.constant 0 : i32
    %c0_i32_1 = arith.constant 0 : i32
    return %c0_i32, %c0_i32_0 : i32, i32
  }
  func.func @transform_8(%arg0: i32) -> (i32, i32) {
    %c0_i32 = arith.constant 0 : i32
    %c0_i32_0 = arith.constant 0 : i32
    %c0_i32_1 = arith.constant 0 : i32
    return %c0_i32, %c0_i32_0 : i32, i32
  }
  func.func @transform_9(%arg0: i32) -> (i32, i32, i32) {
    %c0_i32 = arith.constant 0 : i32
    %c0_i32_0 = arith.constant 0 : i32
    %c0_i32_1 = arith.constant 0 : i32
    %c0_i32_2 = arith.constant 0 : i32
    return %c0_i32, %c0_i32_0, %c0_i32_1 : i32, i32, i32
  }
  func.func @transform_10(%arg0: i32) -> (i32, i32, i32) {
    %c0_i32 = arith.constant 0 : i32
    %c0_i32_0 = arith.constant 0 : i32
    %c0_i32_1 = arith.constant 0 : i32
    %c0_i32_2 = arith.constant 0 : i32
    return %c0_i32, %c0_i32_0, %c0_i32_1 : i32, i32, i32
  }
  func.func @transform_11(%arg0: i32) -> (i32, i32) {
    %c0_i32 = arith.constant 0 : i32
    %c0_i32_0 = arith.constant 0 : i32
    %c0_i32_1 = arith.constant 0 : i32
    return %c0_i32, %c0_i32_0 : i32, i32
  }
  func.func @transform_12(%arg0: i32) -> (i32, i32) {
    %c0_i32 = arith.constant 0 : i32
    %c0_i32_0 = arith.constant 0 : i32
    %c0_i32_1 = arith.constant 0 : i32
    return %c0_i32, %c0_i32_0 : i32, i32
  }
  func.func @transform_13(%arg0: i32) -> (i32, i32) {
    %c0_i32 = arith.constant 0 : i32
    %c0_i32_0 = arith.constant 0 : i32
    %c0_i32_1 = arith.constant 0 : i32
    return %c0_i32, %c0_i32_0 : i32, i32
  }
  func.func @transform_14(%arg0: i32) -> (i32, i32) {
    %c0_i32 = arith.constant 0 : i32
    %c0_i32_0 = arith.constant 0 : i32
    %c0_i32_1 = arith.constant 0 : i32
    return %c0_i32, %c0_i32_0 : i32, i32
  }
  func.func @transform_15(%arg0: i32) -> (i32, i32) {
    %c0_i32 = arith.constant 0 : i32
    %c0_i32_0 = arith.constant 0 : i32
    %c0_i32_1 = arith.constant 0 : i32
    return %c0_i32, %c0_i32_0 : i32, i32
  }
}

</mosaic_0001>

<bundles_post_ra>
// kernel: vae_forward.1
= control target key start
LH: loop header
LB: loop body
LE: loop exit
PB: predicated region body
PF: predicated region fallthrough
CT: control target
= control target key end

     0   :  { %20 = vsyncpa [#allocation3], 0  ;;  %s2566_s0 = inlined_call_operand.vmem [shape: f32[16,128], index: 0, kind: input, shape index: {}]   ;;  %s2567_s1 = inlined_call_operand.vmem [shape: f32[16,16], index: 1, kind: input, shape index: {}]   ;;  %s2568_s2 = inlined_call_operand.vmem [shape: f32[2,128,128], index: 2, kind: input, shape index: {}]   ;;  %s2569_s3 = inlined_call_operand.vmem [shape: f32[2,1,128], index: 3, kind: input, shape index: {}]   ;;  %s2570_s4 = inlined_call_operand.hbm [shape: f32[2,128,128], index: 4, kind: input, shape index: {}]   ;;  %s2571_s5 = inlined_call_operand.vmem [shape: f32[2,1,128], index: 5, kind: input, shape index: {}]   ;;  %s2572_s6 = inlined_call_operand.vmem [shape: f32[8,16], index: 6, kind: input, shape index: {}]   ;;  %s2573_s7 = inlined_call_operand.vmem [shape: f32[128,128], index: 7, kind: input, shape index: {}]   ;;  %s2574_s8 = inlined_call_operand.hbm [shape: f32[1,128], index: 8, kind: input, shape index: {}]   ;;  %s2575_s9 = inlined_call_operand.hbm [shape: f32[2,128,128], index: 9, kind: input, shape index: {}]   ;;  %s2576_s10 = inlined_call_operand.vmem [shape: f32[2,1,128], index: 10, kind: input, shape index: {}]   ;;  %s2577_s11 = inlined_call_operand.hbm [shape: f32[128,256], index: 11, kind: input, shape index: {}]   ;;  %s2578_s12 = inlined_call_operand.vmem [shape: f32[1,256], index: 12, kind: input, shape index: {}]   ;;  %s2579_s13 = inlined_call_operand.vmem [shape: f32[8,256], index: 13, kind: input, shape index: {}]   ;;  %s2580_s14 = inlined_call_operand.hbm [shape: f32[128,128], index: 14, kind: input, shape index: {}]   ;;  %s2581_s15 = inlined_call_operand.vmem [shape: f32[8,128], index: 15, kind: output, shape index: {}]  }
   0x1   :  { %21 = vsyncpa [#allocation5], 0 }
   0x2   :  { %22 = vsyncpa [#allocation8], 0  ;;  %s2151_s18 = smov [#allocation4]   ;;  %s2152_s20 = smov [#allocation7]  }
   0x3   :  { %s55_s19 = sshll.u32 %s2151_s18, 4  ;;  %s78_s21 = sshll.u32 %s2152_s20, 4  ;;  %s56_s19 = int_to_ptr.vmem [resolvable:$true] %s55_s19  ;;  %s2244_s21 = int_to_ptr.vmem [resolvable:$true] %s78_s21 }
   0x4   :  { %s2035_s24 = scalar_lea.hbm %s2574_s8, 16 }
   0x5   :  { %p2036_p0 = scmp.ne.s32.totalorder %s2574_s8, %s2035_s24  ;;  %p2039_p1 = scmp.lt.u32.totalorder %s2035_s24, %s2574_s8 }
   0x7   :  { %p2041_p2 = pnand %p2039_p1, %p2036_p0 }
   0x9   :  { %2044 = shalt.err (!%p2041_p2)
}
   0xa   :  { %s2045_s29 = scalar_lea.vmem %s56_s19, 16  ;;  %s2049_s30 = scalar_lea.vmem %s56_s19, 32 }
   0xb   :  { %p2046_p3 = scmp.ne.s32.totalorder %s56_s19, %s2045_s29  ;;  %p2050_p4 = scmp.lt.s32.totalorder %s56_s19, %s56_s19 }
   0xc   :  { %p2051_p5 = scmp.lt.s32.totalorder %s2049_s30, %s2045_s29 }
   0xe   :  { %p2052_p6 = por %p2051_p5, %p2050_p4 }
  0x10   :  { %p2053_p7 = pnand %p2052_p6, %p2046_p3 }
  0x12   :  { %2056 = shalt.err (!%p2053_p7)
}
  0x13   :  { %58 = dma.hbm_to_vmem [thread:$0]  %s2574_s8, 16, %s56_s19, [#allocation5]  }
  0x14   :  { %s2057_s22 = scalar_lea.hbm %s2577_s11, 4096 }
  0x15   :  { %p2058_p8 = scmp.ne.s32.totalorder %s2577_s11, %s2057_s22  ;;  %p2061_p9 = scmp.lt.u32.totalorder %s2057_s22, %s2577_s11 }
  0x17   :  { %p2063_p10 = pnand %p2061_p9, %p2058_p8 }
  0x19   :  { %2066 = shalt.err (!%p2063_p10)
}
  0x1a   :  { %s2067_s27 = scalar_lea.vmem %s2244_s21, 4096  ;;  %p2072_p12 = scmp.lt.s32.totalorder %s2244_s21, %s2244_s21 }
  0x1b   :  { %p2068_p11 = scmp.ne.s32.totalorder %s2244_s21, %s2067_s27  ;;  %p2073_p13 = scmp.lt.s32.totalorder %s2067_s27, %s2067_s27 }
  0x1d   :  { %p2074_p0 = por %p2073_p13, %p2072_p12 }
  0x1f   :  { %p2075_p1 = pnand %p2074_p0, %p2068_p11 }
  0x21   :  { %2078 = shalt.err (!%p2075_p1)
}
  0x22   :  { %s2153_s8 = smov 256   ;;  %s2154_s19 = smov 16  }
  0x23   :  { %84 = dma.hbm_to_vmem [thread:$0]  %s2577_s11, 4096, %s2244_s21, [#allocation8], %s2153_s8, %s2153_s8, %s2154_s19  }
  0x24   :  { %s2155_s30 = smov [#allocation2]   ;;  %s2079_s20 = scalar_lea.hbm %s2570_s4, 4096 }
  0x25   :  { %s36_s16 = sshll.u32 %s2155_s30, 4  ;;  %p2080_p2 = scmp.ne.s32.totalorder %s2570_s4, %s2079_s20  ;;  %s37_s16 = int_to_ptr.vmem [resolvable:$true] %s36_s16 }
  0x26   :  { %p2083_p3 = scmp.lt.u32.totalorder %s2079_s20, %s2570_s4 }
  0x28   :  { %p2085_p4 = pnand %p2083_p3, %p2080_p2 }
  0x2a   :  { %2088 = shalt.err (!%p2085_p4)
}
  0x2b   :  { %s2089_s26 = scalar_lea.vmem %s37_s16, 4096  ;;  %p2094_p6 = scmp.lt.s32.totalorder %s37_s16, %s37_s16 }
  0x2c   :  { %p2090_p5 = scmp.ne.s32.totalorder %s37_s16, %s2089_s26  ;;  %p2095_p7 = scmp.lt.s32.totalorder %s2089_s26, %s2089_s26 }
  0x2e   :  { %p2096_p8 = por %p2095_p7, %p2094_p6 }
  0x30   :  { %p2097_p9 = pnand %p2096_p8, %p2090_p5 }
  0x32   :  { %2100 = shalt.err (!%p2097_p9)
}
  0x33   :  { %s2156_s11 = smov 128   ;;  %s2157_s21 = smov 8  }
  0x34   :  { %42 = dma.hbm_to_vmem [thread:$0]  %s2570_s4, 4096, %s37_s16, [#allocation3], %s2156_s11, %s2156_s11, %s2157_s21  }
  0x35   :  { %s2158_s19 = smov [#allocation6]   ;;  %s2159_s29 = smov [#allocation9]  }
  0x36   :  { %s64_s28 = sshll.u32 %s2158_s19, 4  ;;  %s94_s30 = sshll.u32 %s2159_s29, 4  ;;  %s65_s28 = int_to_ptr.vmem [resolvable:$true] %s64_s28  ;;  %s95_s30 = int_to_ptr.vmem [resolvable:$true] %s94_s30 }
  0x37   :  { %s2101_s20 = scalar_lea.hbm %s2575_s9, 4096 }
  0x38   :  { %p2102_p10 = scmp.ne.s32.totalorder %s2575_s9, %s2101_s20  ;;  %p2105_p11 = scmp.lt.u32.totalorder %s2101_s20, %s2575_s9 }
  0x3a   :  { %p2107_p12 = pnand %p2105_p11, %p2102_p10 }
  0x3c   :  { %2110 = shalt.err (!%p2107_p12)
}
  0x3d   :  { %s2111_s4 = scalar_lea.vmem %s65_s28, 4096  ;;  %p2116_p0 = scmp.lt.s32.totalorder %s65_s28, %s65_s28 }
  0x3e   :  { %p2112_p13 = scmp.ne.s32.totalorder %s65_s28, %s2111_s4  ;;  %p2117_p1 = scmp.lt.s32.totalorder %s2111_s4, %s2111_s4 }
  0x40   :  { %p2118_p2 = por %p2117_p1, %p2116_p0 }
  0x42   :  { %p2119_p3 = pnand %p2118_p2, %p2112_p13 }
  0x44   :  { %2122 = shalt.err (!%p2119_p3)
}
  0x45   :  { %70 = dma.hbm_to_vmem [thread:$0]  %s2575_s9, 4096, %s65_s28, [#allocation5], %s2156_s11, %s2156_s11, %s2157_s21  }
  0x46   :  { %s2123_s19 = scalar_lea.hbm %s2580_s14, 2048 }
  0x47   :  { %p2124_p4 = scmp.ne.s32.totalorder %s2580_s14, %s2123_s19  ;;  %p2127_p5 = scmp.lt.u32.totalorder %s2123_s19, %s2580_s14 }
  0x49   :  { %p2129_p6 = pnand %p2127_p5, %p2124_p4 }
  0x4b   :  { %2132 = shalt.err (!%p2129_p6)
}
  0x4c   :  { %s2133_s22 = scalar_lea.vmem %s95_s30, 2048  ;;  %p2138_p8 = scmp.lt.s32.totalorder %s95_s30, %s95_s30 }
  0x4d   :  { %p2134_p7 = scmp.ne.s32.totalorder %s95_s30, %s2133_s22  ;;  %p2139_p9 = scmp.lt.s32.totalorder %s2133_s22, %s2133_s22 }
  0x4f   :  { %p2140_p10 = por %p2139_p9, %p2138_p8 }
  0x51   :  { %p2141_p11 = pnand %p2140_p10, %p2134_p7 }
  0x53   :  { %2144 = shalt.err (!%p2141_p11)
}
  0x54   :  { %100 = dma.hbm_to_vmem [thread:$0]  %s2580_s14, 2048, %s95_s30, [#allocation8], %s2156_s11, %s2156_s11, %s2157_s21  }
  0x55   :  { %2145 = dma.done.wait [#allocation3], 4096  }
  0x56   :  { %2146 = vsyncadd [#allocation3], 4294963200 }
  0x57   :  { %2147 = dma.done.wait [#allocation5], 4112  }
  0x58   :  { %2148 = vsyncadd [#allocation5], 4294963184 }
  0x59   :  { %2149 = dma.done.wait [#allocation8], 6144  }
  0x5a   :  { %2150 = vsyncadd [#allocation8], 4294961152  ;;  %vm120_vm0 = vcmask 130048   ;;  %v116_v0 = vld [vmem:[%s2566_s0] sm:$0xff]  ;;  %v117_v1 = vld [vmem:[%s2566_s0 + $0x8] sm:$0xff]  ;;  %vm2161_vm7 = vmmov 0  }
  0x5b   :  { %v2329_v2 = vld [vmem:[%s2567_s1] sm:$0xff]  ;;  %v1755_v3 = vpack.c.bf16 %v117_v1, %v116_v0  ;;  %v203_v5 = vld [vmem:[%s2568_s2 + $0x8] sm:$0xff]  ;;  %v204_v7 = vld [vmem:[%s2568_s2 + $0x10] sm:$0xff] }
  0x5c   :  { %1458 = vmatprep.mubr.msk.f32.mxu0 %vm120_vm0, %v2329_v2  ;;  %v202_v4 = vld [vmem:[%s2568_s2] sm:$0xff]  ;;  %v205_v8 = vld [vmem:[%s2568_s2 + $0x18] sm:$0xff]  ;;  %v207_v11 = vld [vmem:[%s2568_s2 + $0x28] sm:$0xff] }
  0x5d   :  { %v1759_v6 = vpack.c.bf16 %v203_v5, %v202_v4  ;;  %1756 = vmatprep.subr.bf16.mxu0 %v1755_v3  ;;  %v1763_v9 = vpack.c.bf16 %v205_v8, %v204_v7  ;;  %v206_v10 = vld [vmem:[%s2568_s2 + $0x20] sm:$0xff]  ;;  %v2354_v12 = vld [vmem:[%s2567_s1 + $0x8] sm:$0xff]  ;;  %v208_v14 = vld [vmem:[%s2568_s2 + $0x30] sm:$0xff] }
  0x5e   :  { %1758 = vmatpush3.bf16.msra.mxu0 %v1755_v3  ;;  %v1767_v13 = vpack.c.bf16 %v207_v11, %v206_v10  ;;  %v209_v15 = vld [vmem:[%s2568_s2 + $0x38] sm:$0xff]  ;;  %v210_v17 = vld [vmem:[%s2568_s2 + $0x40] sm:$0xff]  ;;  %v211_v18 = vld [vmem:[%s2568_s2 + $0x48] sm:$0xff] }
  0x5f   :  { %1760 = vmatprep.subr.bf16.mxu1 %v1759_v6  ;;  %v1771_v16 = vpack.c.bf16 %v209_v15, %v208_v14  ;;  %v1775_v19 = vpack.c.bf16 %v211_v18, %v210_v17  ;;  %v212_v20 = vld [vmem:[%s2568_s2 + $0x50] sm:$0xff]  ;;  %v213_v21 = vld [vmem:[%s2568_s2 + $0x58] sm:$0xff]  ;;  %v214_v23 = vld [vmem:[%s2568_s2 + $0x60] sm:$0xff] }
  0x60   :  { %1762 = vmatpush3.bf16.msra.mxu1 %v1759_v6  ;;  %v1779_v22 = vpack.c.bf16 %v213_v21, %v212_v20  ;;  %v215_v24 = vld [vmem:[%s2568_s2 + $0x68] sm:$0xff]  ;;  %v216_v26 = vld [vmem:[%s2568_s2 + $0x70] sm:$0xff]  ;;  %v217_v27 = vld [vmem:[%s2568_s2 + $0x78] sm:$0xff] }
  0x61   :  { %1764 = vmatprep.subr.bf16.mxu1 %v1763_v9  ;;  %1459 = vmatmul.mubr.msk.f32.vlgmr.msra.gmra.mrb[0].mxu0 %vm120_vm0, %v2354_v12  ;;  %v1783_v25 = vpack.c.bf16 %v215_v24, %v214_v23  ;;  %v1787_v28 = vpack.c.bf16 %v217_v27, %v216_v26  ;;  %v306_v29 = vld [vmem:[#allocation2] sm:$0xff]  ;;  %v307_v30 = vld [vmem:[#allocation2 + $0x8] sm:$0xff]  ;;  %v308_v31 = vld [vmem:[#allocation2 + $0x10] sm:$0xff] }
  0x62   :  { %v1791_v32 = vpack.c.bf16 %v307_v30, %v306_v29  ;;  %v309_v33 = vld [vmem:[#allocation2 + $0x18] sm:$0xff]  ;;  %v310_v35 = vld [vmem:[#allocation2 + $0x20] sm:$0xff]  ;;  %v311_v36 = vld [vmem:[#allocation2 + $0x28] sm:$0xff] }
  0x63   :  { %v1795_v34 = vpack.c.bf16 %v309_v33, %v308_v31  ;;  %v1799_v37 = vpack.c.bf16 %v311_v36, %v310_v35  ;;  %v312_v38 = vld [vmem:[#allocation2 + $0x30] sm:$0xff]  ;;  %v313_v39 = vld [vmem:[#allocation2 + $0x38] sm:$0xff]  ;;  %v314_v41 = vld [vmem:[#allocation2 + $0x40] sm:$0xff] }
  0x64   :  { %1766 = vmatpush3.bf16.msra.mxu1 %v1763_v9  ;;  %1792 = vmatprep.subr.bf16.mxu0 %v1791_v32  ;;  %v1803_v40 = vpack.c.bf16 %v313_v39, %v312_v38  ;;  %v315_v42 = vld [vmem:[#allocation2 + $0x48] sm:$0xff]  ;;  %v316_v44 = vld [vmem:[#allocation2 + $0x50] sm:$0xff]  ;;  %v317_v45 = vld [vmem:[#allocation2 + $0x58] sm:$0xff] }
  0x65   :  { %1768 = vmatprep.subr.bf16.mxu1 %v1767_v13  ;;  %1794 = vmatpush3.bf16.msra.mxu0 %v1791_v32  ;;  %v1807_v43 = vpack.c.bf16 %v315_v42, %v314_v41  ;;  %v1811_v46 = vpack.c.bf16 %v317_v45, %v316_v44  ;;  %v318_v49 = vld [vmem:[#allocation2 + $0x60] sm:$0xff]  ;;  %v319_v50 = vld [vmem:[#allocation2 + $0x68] sm:$0xff]  ;;  %v320_v52 = vld [vmem:[#allocation2 + $0x70] sm:$0xff] }
  0x66   :  { %1796 = vmatprep.subr.bf16.mxu0 %v1795_v34  ;;  %v1815_v51 = vpack.c.bf16 %v319_v50, %v318_v49  ;;  %v321_v53 = vld [vmem:[#allocation2 + $0x78] sm:$0xff]  ;;  %v1272_v55 = vld [vmem:[%s2569_s3] ss:$0 sm:$0xff]  ;;  %v1278_v14 = vld [vmem:[%s2568_s2 + $0x90] sm:$0xff] }
  0x67   :  { %v1819_v54 = vpack.c.bf16 %v321_v53, %v320_v52  ;;  %v1273_v0 = vld [vmem:[%s2571_s5] ss:$0 sm:$0xff]  ;;  %v1279_v15 = vld [vmem:[%s2568_s2 + $0x98] sm:$0xff]  ;;  %v1281_v18 = vld [vmem:[%s2568_s2 + $0xa8] sm:$0xff] }
  0x68   :  { %1770 = vmatpush3.bf16.msra.mxu1 %v1767_v13  ;;  %v1276_v8 = vld [vmem:[%s2568_s2 + $0x80] sm:$0xff]  ;;  %v1282_v20 = vld [vmem:[%s2568_s2 + $0xb0] sm:$0xff]  ;;  %v1283_v21 = vld [vmem:[%s2568_s2 + $0xb8] sm:$0xff] }
  0x69   :  { %1772 = vmatprep.subr.bf16.mxu1 %v1771_v16  ;;  %1798 = vmatpush3.bf16.msra.mxu0 %v1795_v34  ;;  %v1280_v17 = vld [vmem:[%s2568_s2 + $0xa0] sm:$0xff]  ;;  %v1287_v26 = vld [vmem:[%s2568_s2 + $0xd8] sm:$0xff]  ;;  %v1289_v29 = vld [vmem:[%s2568_s2 + $0xe8] sm:$0xff] }
  0x6a   :  { %1800 = vmatprep.subr.bf16.mxu0 %v1799_v37  ;;  %v1284_v23 = vld [vmem:[%s2568_s2 + $0xc0] sm:$0xff]  ;;  %v1290_v31 = vld [vmem:[%s2568_s2 + $0xf0] sm:$0xff]  ;;  %v1291_v32 = vld [vmem:[%s2568_s2 + $0xf8] sm:$0xff] }
  0x6b   :  { %v1855_v33 = vpack.c.bf16 %v1291_v32, %v1290_v31  ;;  %v592_v34 = vld [vmem:[#allocation2 + $0x80] sm:$0xff]  ;;  %v593_v35 = vld [vmem:[#allocation2 + $0x88] sm:$0xff]  ;;  %v594_v36 = vld [vmem:[#allocation2 + $0x90] sm:$0xff] }
  0x6c   :  { %1774 = vmatpush3.bf16.msra.mxu1 %v1771_v16  ;;  %v1831_v16 = vpack.c.bf16 %v1279_v15, %v1278_v14  ;;  %v595_v38 = vld [vmem:[#allocation2 + $0x98] sm:$0xff]  ;;  %v597_v41 = vld [vmem:[#allocation2 + $0xa8] sm:$0xff]  ;;  %v602_v49 = vld [vmem:[#allocation2 + $0xd0] sm:$0xff] }
  0x6d   :  { %1776 = vmatprep.subr.bf16.mxu1 %v1775_v19  ;;  %1802 = vmatpush3.bf16.msra.mxu0 %v1799_v37  ;;  %v1859_v37 = vpack.c.bf16 %v593_v35, %v592_v34  ;;  %v1863_v39 = vpack.c.bf16 %v595_v38, %v594_v36  ;;  %v599_v44 = vld [vmem:[#allocation2 + $0xb8] sm:$0xff]  ;;  %v775_v14 = vld [vmem:[%s2573_s7 + $0x20] sm:$0xff]  ;;  %v776_v15 = vld [vmem:[%s2573_s7 + $0x28] sm:$0xff] }
  0x6e   :  { %1804 = vmatprep.subr.bf16.mxu0 %v1803_v40  ;;  %v603_v50 = vld [vmem:[#allocation2 + $0xd8] sm:$0xff]  ;;  %v1295_v31 = vld [vmem:[%s2571_s5 + $0x1] ss:$0 sm:$0xff] }
  0x70   :  { %1778 = vmatpush3.bf16.msra.mxu1 %v1775_v19  ;;  %v1835_v19 = vpack.c.bf16 %v1281_v18, %v1280_v17  ;;  %v777_v17 = vld [vmem:[%s2573_s7 + $0x30] sm:$0xff]  ;;  %v778_v18 = vld [vmem:[%s2573_s7 + $0x38] sm:$0xff] }
  0x71   :  { %1780 = vmatprep.subr.bf16.mxu1 %v1779_v22  ;;  %1806 = vmatpush3.bf16.msra.mxu0 %v1803_v40  ;;  %v596_v40 = vld [vmem:[#allocation2 + $0xa0] sm:$0xff] }
  0x72   :  { %1808 = vmatprep.subr.bf16.mxu0 %v1807_v43  ;;  %v1867_v42 = vpack.c.bf16 %v597_v41, %v596_v40  ;;  %v697_v41 = vld [vmem:[%s2572_s6] sm:$0xff] }
  0x74   :  { %1782 = vmatpush3.bf16.msra.mxu1 %v1779_v22  ;;  %v1839_v22 = vpack.c.bf16 %v1283_v21, %v1282_v20  ;;  %v779_v20 = vld [vmem:[%s2573_s7 + $0x40] sm:$0xff]  ;;  %v780_v21 = vld [vmem:[%s2573_s7 + $0x48] sm:$0xff] }
  0x75   :  { %1784 = vmatprep.subr.bf16.mxu1 %v1783_v25  ;;  %1810 = vmatpush3.bf16.msra.mxu0 %v1807_v43  ;;  %v598_v43 = vld [vmem:[#allocation2 + $0xb0] sm:$0xff] }
  0x76   :  { %1812 = vmatprep.subr.bf16.mxu0 %v1811_v46  ;;  %v1871_v45 = vpack.c.bf16 %v599_v44, %v598_v43  ;;  %v865_v43 = vld [vmem:[#allocation6 + $0x8] sm:$0xff]  ;;  %v866_v44 = vld [vmem:[#allocation6 + $0x10] sm:$0xff] }
  0x78   :  { %1786 = vmatpush3.bf16.msra.mxu1 %v1783_v25  ;;  %v1286_v25 = vld [vmem:[%s2568_s2 + $0xd0] sm:$0xff] }
  0x79   :  { %1788 = vmatprep.subr.bf16.mxu1 %v1787_v28  ;;  %1814 = vmatpush3.bf16.msra.mxu0 %v1811_v46  ;;  %v1847_v27 = vpack.c.bf16 %v1287_v26, %v1286_v25  ;;  %v600_v46 = vld [vmem:[#allocation2 + $0xc0] sm:$0xff]  ;;  %v784_v26 = vld [vmem:[%s2573_s7 + $0x68] sm:$0xff] }
  0x7a   :  { %1816 = vmatprep.subr.bf16.mxu0 %v1815_v51  ;;  %v783_v25 = vld [vmem:[%s2573_s7 + $0x60] sm:$0xff] }
  0x7c   :  { %1790 = vmatpush3.bf16.msra.mxu1 %v1787_v28  ;;  %v1288_v28 = vld [vmem:[%s2568_s2 + $0xe0] sm:$0xff] }
  0x7d   :  { %1818 = vmatpush3.bf16.msra.mxu0 %v1815_v51  ;;  %v1851_v30 = vpack.c.bf16 %v1289_v29, %v1288_v28  ;;  %1860 = vmatprep.subr.bf16.mxu1 %v1859_v37  ;;  %v1879_v51 = vpack.c.bf16 %v603_v50, %v602_v49  ;;  %v785_v28 = vld [vmem:[%s2573_s7 + $0x70] sm:$0xff]  ;;  %v786_v29 = vld [vmem:[%s2573_s7 + $0x78] sm:$0xff] }
  0x7e   :  { %1820 = vmatprep.subr.bf16.mxu0 %v1819_v54  ;;  %v869_v49 = vld [vmem:[#allocation6 + $0x28] sm:$0xff] }
  0x81   :  { %1822 = vmatpush3.bf16.msra.mxu0 %v1819_v54  ;;  %v604_v54 = vld [vmem:[#allocation2 + $0xe0] sm:$0xff] }
 0x134   :  { %v1460_v47 = vpop.f32.mrb[0].mxu0 }
 0x135   :  { %v193_v48 = vpop.f32.mrb[1].mxu0 }
 0x136   :  { %1493 = vmatprep.mubr.f32.mxu1 %v193_v48 }
 0x137   :  { %1494 = vmatmul.mubr.f32.vlgmr.msra.gmra.mrb[0].mxu1 %v1460_v47  ;;  %v601_v47 = vld [vmem:[#allocation2 + $0xc8] sm:$0xff] }
 0x138   :  { %1862 = vmatpush3.bf16.msra.mxu1 %v1859_v37  ;;  %v1875_v48 = vpack.c.bf16 %v601_v47, %v600_v46  ;;  %v867_v46 = vld [vmem:[#allocation6 + $0x18] sm:$0xff] }
 0x139   :  { %1864 = vmatprep.subr.bf16.mxu1 %v1863_v39  ;;  %v1922_v47 = vpack.c.bf16 %v867_v46, %v866_v44  ;;  %v1060_v44 = vld [vmem:[#allocation7 + $0x30] sm:$0xff]  ;;  %v1065_v46 = vld [vmem:[#allocation7 + $0x58] sm:$0xff] }
 0x13c   :  { %1866 = vmatpush3.bf16.msra.mxu1 %v1863_v39 }
 0x13d   :  { %1868 = vmatprep.subr.bf16.mxu1 %v1867_v42 }
 0x140   :  { %1870 = vmatpush3.bf16.msra.mxu1 %v1867_v42  ;;  %v864_v42 = vld [vmem:[#allocation6] sm:$0xff] }
 0x141   :  { %1872 = vmatprep.subr.bf16.mxu1 %v1871_v45 }
 0x144   :  { %1874 = vmatpush3.bf16.msra.mxu1 %v1871_v45  ;;  %v1919_v45 = vpack.c.bf16 %v865_v43, %v864_v42  ;;  %v1058_v43 = vld [vmem:[#allocation7 + $0x20] sm:$0xff] }
 0x145   :  { %1876 = vmatprep.subr.bf16.mxu1 %v1875_v48 }
 0x148   :  { %1878 = vmatpush3.bf16.msra.mxu1 %v1875_v48  ;;  %v868_v48 = vld [vmem:[#allocation6 + $0x20] sm:$0xff] }
 0x149   :  { %1880 = vmatprep.subr.bf16.mxu1 %v1879_v51  ;;  %v1925_v50 = vpack.c.bf16 %v869_v49, %v868_v48  ;;  %v1062_v49 = vld [vmem:[#allocation7 + $0x40] sm:$0xff] }
 0x14c   :  { %1882 = vmatpush3.bf16.msra.mxu1 %v1879_v51  ;;  %v870_v51 = vld [vmem:[#allocation6 + $0x30] sm:$0xff] }
 0x20a   :  { %v1495_v56 = vpop.f32.mrb[0].mxu1 }
 0x20b   :  { %v297_v57 = vadd.f32 %v1495_v56, %v1272_v55  ;;  %v291_v58 = vpop.f32.mrb[1].mxu1 }
 0x20c   :  { %v292_v59 = vadd.f32 %v1272_v55, %v291_v58  ;;  %v605_v55 = vld [vmem:[#allocation2 + $0xe8] sm:$0xff]  ;;  %v607_v58 = vld [vmem:[#allocation2 + $0xf8] sm:$0xff] }
 0x20d   :  { %v303_v60 = vmul.f32 0.2, %v297_v57  ;;  %vm301_vm1 = vcmp.gt.f32.partialorder %v297_v57, 0.0  ;;  %v1883_v56 = vpack.c.bf16 %v605_v55, %v604_v54  ;;  %v872_v54 = vld [vmem:[#allocation6 + $0x40] sm:$0xff]  ;;  %v873_v55 = vld [vmem:[#allocation6 + $0x48] sm:$0xff] }
 0x20e   :  { %v302_v61 = vmul.f32 0.2, %v292_v59  ;;  %vm300_vm2 = vcmp.gt.f32.partialorder %v292_v59, 0.0 }
 0x20f   :  { %v305_v63 = vsel %vm301_vm1, %v297_v57, %v303_v60  ;;  %1884 = vmatprep.subr.bf16.mxu1 %v1883_v56  ;;  %v606_v57 = vld [vmem:[#allocation2 + $0xf0] sm:$0xff]  ;;  %v1293_v60 = vld [vmem:[%s2569_s3 + $0x1] ss:$0 sm:$0xff] }
 0x210   :  { %v304_v62 = vsel %vm300_vm2, %v292_v59, %v302_v61  ;;  %1886 = vmatpush3.bf16.msra.mxu1 %v1883_v56  ;;  %v1887_v59 = vpack.c.bf16 %v607_v58, %v606_v57  ;;  %v1931_v56 = vpack.c.bf16 %v873_v55, %v872_v54  ;;  %v874_v57 = vld [vmem:[#allocation6 + $0x50] sm:$0xff]  ;;  %v875_v58 = vld [vmem:[#allocation6 + $0x58] sm:$0xff]  ;;  %v1066_v55 = vld [vmem:[#allocation7 + $0x60] sm:$0xff] }
 0x211   :  { %1528 = vmatprep.mubr.f32.mxu0 %v304_v62 }
 0x212   :  { %1529 = vmatmul.mubr.f32.vlgmr.msra.gmra.mrb[2].mxu0 %v305_v63  ;;  %1888 = vmatprep.subr.bf16.mxu1 %v1887_v59 }
 0x213   :  { %1535 = vmatprep.mubr.msk.f32.mxu0 %vm120_vm0, %v2329_v2  ;;  %v1277_v2 = vld [vmem:[%s2568_s2 + $0x88] sm:$0xff] }
 0x214   :  { %v1827_v13 = vpack.c.bf16 %v1277_v2, %v1276_v8  ;;  %1890 = vmatpush3.bf16.msra.mxu1 %v1887_v59  ;;  %v771_v8 = vld [vmem:[%s2573_s7] sm:$0xff]  ;;  %v772_v2 = vld [vmem:[%s2573_s7 + $0x8] sm:$0xff]  ;;  %v1934_v59 = vpack.c.bf16 %v875_v58, %v874_v57 }
 0x215   :  { %v1071_v57 = vld [vmem:[#allocation7 + $0x88] sm:$0xff]  ;;  %v1073_v58 = vld [vmem:[#allocation7 + $0x98] sm:$0xff] }
 0x2e5   :  { %v1530_v1 = vpop.f32.mrb[2].mxu0 }
 0x2e6   :  { %v401_v3 = vadd.f32 %v1530_v1, %v1273_v0  ;;  %v395_v4 = vpop.f32.mrb[3].mxu0 }
 0x2e7   :  { %v396_v5 = vadd.f32 %v1273_v0, %v395_v4 }
 0x2e8   :  { %vm405_vm3 = vcmp.gt.f32.partialorder %v401_v3, 0.0  ;;  %v407_v6 = vmul.f32 0.2, %v401_v3 }
 0x2e9   :  { %vm404_vm4 = vcmp.gt.f32.partialorder %v396_v5, 0.0  ;;  %v406_v7 = vmul.f32 0.2, %v396_v5 }
 0x2ea   :  { %v409_v9 = vsel %vm405_vm3, %v401_v3, %v407_v6  ;;  %v2160_v6 = vmov 0.0|0.0  }
 0x2eb   :  { %v408_v10 = vsel %vm404_vm4, %v396_v5, %v406_v7  ;;  %1894 = vmatprep.subr.bf16.mxu1 %v2160_v6  ;;  %v2162_v7 = vmov 0.0  }
 0x2ec   :  { %v1823_v11 = vpack.c.bf16 %v409_v9, %v408_v10  ;;  %v773_v9 = vld [vmem:[%s2573_s7 + $0x10] sm:$0xff]  ;;  %v1895_v10 = vpack.c.bf16 %v772_v2, %v771_v8 }
 0x2ed   :  { %v960_v8 = vld [vmem:[#allocation6 + $0x88] sm:$0xff]  ;;  %v961_v2 = vld [vmem:[#allocation6 + $0x90] sm:$0xff] }
 0x2ee   :  { %1824 = vmatprep.subr.bf16.mxu0 %v1823_v11 }
 0x2ef   :  { %1826 = vmatpush3.bf16.msra.mxu0 %v1823_v11  ;;  %v774_v11 = vld [vmem:[%s2573_s7 + $0x18] sm:$0xff] }
 0x2f0   :  { %1828 = vmatprep.subr.bf16.mxu0 %v1827_v13 }
 0x2f2   :  { %1536 = vmatmul.mubr.msk.f32.vlgmr.msra.gmra.mrb[4].mxu0 %vm120_vm0, %v2354_v12  ;;  %v1285_v12 = vld [vmem:[%s2568_s2 + $0xc8] sm:$0xff] }
 0x2f3   :  { %1830 = vmatpush3.bf16.msra.mxu0 %v1827_v13  ;;  %v1843_v24 = vpack.c.bf16 %v1285_v12, %v1284_v23  ;;  %v1898_v13 = vpack.c.bf16 %v774_v11, %v773_v9  ;;  %v781_v23 = vld [vmem:[%s2573_s7 + $0x50] sm:$0xff]  ;;  %v782_v12 = vld [vmem:[%s2573_s7 + $0x58] sm:$0xff] }
 0x2f4   :  { %1832 = vmatprep.subr.bf16.mxu0 %v1831_v16 }
 0x2f7   :  { %1834 = vmatpush3.bf16.msra.mxu0 %v1831_v16  ;;  %v1901_v16 = vpack.c.bf16 %v776_v15, %v775_v14  ;;  %v964_v14 = vld [vmem:[#allocation6 + $0xa8] sm:$0xff] }
 0x2f8   :  { %1836 = vmatprep.subr.bf16.mxu0 %v1835_v19 }
 0x2fb   :  { %1838 = vmatpush3.bf16.msra.mxu0 %v1835_v19  ;;  %v1904_v19 = vpack.c.bf16 %v778_v18, %v777_v17  ;;  %v966_v17 = vld [vmem:[#allocation6 + $0xb8] sm:$0xff] }
 0x2fc   :  { %1840 = vmatprep.subr.bf16.mxu0 %v1839_v22 }
 0x2ff   :  { %1842 = vmatpush3.bf16.msra.mxu0 %v1839_v22  ;;  %v1907_v22 = vpack.c.bf16 %v780_v21, %v779_v20  ;;  %v968_v20 = vld [vmem:[#allocation6 + $0xc8] sm:$0xff] }
 0x300   :  { %1844 = vmatprep.subr.bf16.mxu0 %v1843_v24 }
 0x303   :  { %1846 = vmatpush3.bf16.msra.mxu0 %v1843_v24  ;;  %v1910_v24 = vpack.c.bf16 %v782_v12, %v781_v23  ;;  %v970_v23 = vld [vmem:[#allocation6 + $0xd8] sm:$0xff] }
 0x304   :  { %1848 = vmatprep.subr.bf16.mxu0 %v1847_v27 }
 0x307   :  { %1850 = vmatpush3.bf16.msra.mxu0 %v1847_v27  ;;  %v1913_v27 = vpack.c.bf16 %v784_v26, %v783_v25  ;;  %v972_v25 = vld [vmem:[#allocation6 + $0xe8] sm:$0xff] }
 0x308   :  { %1852 = vmatprep.subr.bf16.mxu0 %v1851_v30 }
 0x30b   :  { %1854 = vmatpush3.bf16.msra.mxu0 %v1851_v30  ;;  %v1916_v30 = vpack.c.bf16 %v786_v29, %v785_v28 }
 0x30c   :  { %1856 = vmatprep.subr.bf16.mxu0 %v1855_v33 }
 0x30f   :  { %1858 = vmatpush3.bf16.msra.mxu0 %v1855_v33 }
 0x310   :  { %1891 = vmatprep.subr.bf16.mxu0 %v2160_v6 }
 0x3c5   :  { %v1537_v52 = vpop.f32.mrb[4].mxu0 }
 0x3c6   :  { %v476_v53 = vpop.f32.mrb[5].mxu0 }
 0x3c7   :  { %1570 = vmatprep.mubr.f32.mxu0 %v476_v53 }
 0x3c8   :  { %1571 = vmatmul.mubr.f32.vlgmr.msra.gmra.mrb[6].mxu0 %v1537_v52  ;;  %v871_v52 = vld [vmem:[#allocation6 + $0x38] sm:$0xff] }
 0x3c9   :  { %1612 = vmatprep.mubr.msk.f32.mxu0 %vm2161_vm7, %v2162_v7  ;;  %v1928_v53 = vpack.c.bf16 %v871_v52, %v870_v51  ;;  %v1067_v51 = vld [vmem:[#allocation7 + $0x68] sm:$0xff]  ;;  %v1069_v52 = vld [vmem:[#allocation7 + $0x78] sm:$0xff] }
 0x3ca   :  { %v1978_v54 = vpack.c.bf16 %v1069_v52, %v1067_v51  ;;  %v1191_v51 = vld [vmem:[#allocation9 + $0x78] sm:$0xff] }
 0x49b   :  { %v1572_v61 = vpop.f32.mrb[6].mxu0 }
 0x49c   :  { %v582_v62 = vadd.f32 %v1572_v61, %v1293_v60  ;;  %v576_v63 = vpop.f32.mrb[7].mxu0  ;;  %v877_v61 = vld [vmem:[#allocation6 + $0x68] sm:$0xff] }
 0x49d   :  { %v577_v0 = vadd.f32 %v1293_v60, %v576_v63  ;;  %v876_v60 = vld [vmem:[#allocation6 + $0x60] sm:$0xff] }
 0x49e   :  { %v588_v1 = vmul.f32 0.2, %v582_v62  ;;  %vm586_vm5 = vcmp.gt.f32.partialorder %v582_v62, 0.0 }
 0x49f   :  { %v587_v3 = vmul.f32 0.2, %v577_v0  ;;  %vm585_vm6 = vcmp.gt.f32.partialorder %v577_v0, 0.0 }
 0x4a0   :  { %v590_v5 = vsel %vm586_vm5, %v582_v62, %v588_v1  ;;  %v1937_v62 = vpack.c.bf16 %v877_v61, %v876_v60  ;;  %v878_v1 = vld [vmem:[#allocation6 + $0x70] sm:$0xff]  ;;  %v1982_v60 = vpack.c.bf16 %v1073_v58, %v1071_v57  ;;  %v1070_v61 = vld [vmem:[#allocation7 + $0x80] sm:$0xff] }
 0x4a1   :  { %v589_v4 = vsel %vm585_vm6, %v577_v0, %v587_v3  ;;  %v879_v3 = vld [vmem:[#allocation6 + $0x78] sm:$0xff] }
 0x4a2   :  { %1605 = vmatprep.mubr.f32.mxu1 %v589_v4  ;;  %v1940_v4 = vpack.c.bf16 %v879_v3, %v878_v1 }
 0x4a3   :  { %1606 = vmatmul.mubr.f32.vlgmr.msra.gmra.mrb[2].mxu1 %v590_v5  ;;  %v959_v5 = vld [vmem:[#allocation6 + $0x80] sm:$0xff] }
 0x4a4   :  { %1647 = vmatprep.mubr.msk.f32.mxu1 %vm2161_vm7, %v2162_v7  ;;  %1896 = vmatpush3.bf16.msra.mxu1 %v1895_v10  ;;  %v1943_v9 = vpack.c.bf16 %v960_v8, %v959_v5  ;;  %v962_v10 = vld [vmem:[#allocation6 + $0x98] sm:$0xff]  ;;  %v1076_v5 = vld [vmem:[#allocation7 + $0xb0] sm:$0xff]  ;;  %v1079_v8 = vld [vmem:[#allocation7 + $0xc8] sm:$0xff] }
 0x4a5   :  { %1897 = vmatprep.subr.bf16.mxu1 %v2160_v6  ;;  %v1946_v11 = vpack.c.bf16 %v962_v10, %v961_v2  ;;  %v1081_v2 = vld [vmem:[#allocation7 + $0xd8] sm:$0xff] }
 0x4a6   :  { %v1990_v10 = vpack.c.bf16 %v1081_v2, %v1079_v8 }
 0x4a8   :  { %1899 = vmatpush3.bf16.msra.mxu1 %v1898_v13  ;;  %v963_v13 = vld [vmem:[#allocation6 + $0xa0] sm:$0xff] }
 0x4a9   :  { %1900 = vmatprep.subr.bf16.mxu1 %v2160_v6  ;;  %v1949_v15 = vpack.c.bf16 %v964_v14, %v963_v13  ;;  %v1080_v13 = vld [vmem:[#allocation7 + $0xd0] sm:$0xff] }
 0x4ac   :  { %1902 = vmatpush3.bf16.msra.mxu1 %v1901_v16  ;;  %v965_v16 = vld [vmem:[#allocation6 + $0xb0] sm:$0xff] }
 0x4ad   :  { %1903 = vmatprep.subr.bf16.mxu1 %v2160_v6  ;;  %v1952_v18 = vpack.c.bf16 %v966_v17, %v965_v16 }
 0x4b0   :  { %1905 = vmatpush3.bf16.msra.mxu1 %v1904_v19  ;;  %v967_v19 = vld [vmem:[#allocation6 + $0xc0] sm:$0xff] }
 0x4b1   :  { %1906 = vmatprep.subr.bf16.mxu1 %v2160_v6  ;;  %v1955_v21 = vpack.c.bf16 %v968_v20, %v967_v19  ;;  %v1083_v20 = vld [vmem:[#allocation7 + $0xe8] sm:$0xff] }
 0x4b4   :  { %1908 = vmatpush3.bf16.msra.mxu1 %v1907_v22  ;;  %v969_v22 = vld [vmem:[#allocation6 + $0xd0] sm:$0xff] }
 0x4b5   :  { %1909 = vmatprep.subr.bf16.mxu1 %v2160_v6  ;;  %v1958_v12 = vpack.c.bf16 %v970_v23, %v969_v22  ;;  %v1082_v23 = vld [vmem:[#allocation7 + $0xe0] sm:$0xff] }
 0x4b8   :  { %1911 = vmatpush3.bf16.msra.mxu1 %v1910_v24  ;;  %v971_v24 = vld [vmem:[#allocation6 + $0xe0] sm:$0xff] }
 0x4b9   :  { %1912 = vmatprep.subr.bf16.mxu1 %v2160_v6  ;;  %v1961_v26 = vpack.c.bf16 %v972_v25, %v971_v24  ;;  %v1176_v25 = vld [vmem:[#allocation9] sm:$0xff] }
 0x4bc   :  { %1914 = vmatpush3.bf16.msra.mxu1 %v1913_v27  ;;  %v1297_v27 = vld [vmem:[#allocation4] ss:$0 sm:$0xff] }
 0x4bd   :  { %1915 = vmatprep.subr.bf16.mxu1 %v2160_v6 }
 0x4c0   :  { %1917 = vmatpush3.bf16.msra.mxu1 %v1916_v30 }
 0x4c1   :  { %1942 = vmatprep.subr.bf16.mxu1 %v2160_v6 }
 0x576   :  { %v1607_v32 = vpop.f32.mrb[2].mxu1 }
 0x577   :  { %v688_v33 = vadd.f32 %v1607_v32, %v1295_v31  ;;  %v682_v34 = vpop.f32.mrb[3].mxu1  ;;  %v974_v32 = vld [vmem:[#allocation6 + $0xf8] sm:$0xff] }
 0x578   :  { %v683_v35 = vadd.f32 %v1295_v31, %v682_v34  ;;  %v973_v31 = vld [vmem:[#allocation6 + $0xf0] sm:$0xff]  ;;  %v1055_v34 = vld [vmem:[#allocation7 + $0x8] sm:$0xff] }
 0x579   :  { %vm692_vm8 = vcmp.gt.f32.partialorder %v688_v33, 0.0  ;;  %v694_v36 = vmul.f32 0.2, %v688_v33 }
 0x57a   :  { %vm691_vm9 = vcmp.gt.f32.partialorder %v683_v35, 0.0  ;;  %v693_v37 = vmul.f32 0.2, %v683_v35 }
 0x57b   :  { %v696_v38 = vsel %vm692_vm8, %v688_v33, %v694_v36  ;;  %v1964_v33 = vpack.c.bf16 %v974_v32, %v973_v31  ;;  %v1054_v36 = vld [vmem:[#allocation7] sm:$0xff]  ;;  %v1181_v32 = vld [vmem:[#allocation9 + $0x28] sm:$0xff] }
 0x57c   :  { %v695_v39 = vsel %vm691_vm9, %v683_v35, %v693_v37  ;;  %v1057_v35 = vld [vmem:[#allocation7 + $0x18] sm:$0xff]  ;;  %v1180_v31 = vld [vmem:[#allocation9 + $0x20] sm:$0xff] }
 0x57d   :  { %v1892_v40 = vpack.c.bf16 %v696_v38, %v695_v39  ;;  %v1966_v37 = vpack.c.bf16 %v1057_v35, %v1055_v34  ;;  %v1056_v38 = vld [vmem:[#allocation7 + $0x10] sm:$0xff]  ;;  %v1059_v39 = vld [vmem:[#allocation7 + $0x28] sm:$0xff]  ;;  %v1183_v34 = vld [vmem:[#allocation9 + $0x38] sm:$0xff] }
 0x57f   :  { %1893 = vmatpush3.bf16.msra.mxu0 %v1892_v40  ;;  %v1061_v40 = vld [vmem:[#allocation7 + $0x38] sm:$0xff] }
 0x580   :  { %1918 = vmatprep.subr.bf16.mxu0 %v2160_v6  ;;  %v1970_v42 = vpack.c.bf16 %v1061_v40, %v1059_v39  ;;  %v1186_v39 = vld [vmem:[#allocation9 + $0x50] sm:$0xff]  ;;  %v1187_v40 = vld [vmem:[#allocation9 + $0x58] sm:$0xff] }
 0x582   :  { %1613 = vmatmul.mubr.msk.f32.vlgmr.msra.gmra.mrb[8].mxu0 %vm120_vm0, %v697_v41  ;;  %v1968_v41 = vpack.c.bf16 %v1056_v38, %v1054_v36  ;;  %v1184_v36 = vld [vmem:[#allocation9 + $0x40] sm:$0xff] }
 0x583   :  { %1682 = vmatprep.mubr.msk.f32.mxu0 %vm2161_vm7, %v2162_v7  ;;  %1920 = vmatpush3.bf16.msra.mxu0 %v1919_v45  ;;  %v1063_v45 = vld [vmem:[#allocation7 + $0x48] sm:$0xff] }
 0x584   :  { %1921 = vmatprep.subr.bf16.mxu0 %v2160_v6  ;;  %v1974_v48 = vpack.c.bf16 %v1065_v46, %v1063_v45 }
 0x587   :  { %1923 = vmatpush3.bf16.msra.mxu0 %v1922_v47  ;;  %v1972_v47 = vpack.c.bf16 %v1060_v44, %v1058_v43 }
 0x588   :  { %1924 = vmatprep.subr.bf16.mxu0 %v2160_v6 }
 0x58b   :  { %1926 = vmatpush3.bf16.msra.mxu0 %v1925_v50  ;;  %v1064_v50 = vld [vmem:[#allocation7 + $0x50] sm:$0xff] }
 0x58c   :  { %1927 = vmatprep.subr.bf16.mxu0 %v2160_v6 }
 0x58f   :  { %1929 = vmatpush3.bf16.msra.mxu0 %v1928_v53  ;;  %v1976_v53 = vpack.c.bf16 %v1064_v50, %v1062_v49  ;;  %v1190_v50 = vld [vmem:[#allocation9 + $0x70] sm:$0xff] }
 0x590   :  { %1930 = vmatprep.subr.bf16.mxu0 %v2160_v6  ;;  %v2020_v52 = vpack.c.bf16 %v1191_v51, %v1190_v50 }
 0x593   :  { %1932 = vmatpush3.bf16.msra.mxu0 %v1931_v56  ;;  %v1068_v56 = vld [vmem:[#allocation7 + $0x70] sm:$0xff] }
 0x594   :  { %1933 = vmatprep.subr.bf16.mxu0 %v2160_v6 }
 0x597   :  { %1935 = vmatpush3.bf16.msra.mxu0 %v1934_v59  ;;  %v1980_v59 = vpack.c.bf16 %v1068_v56, %v1066_v55  ;;  %v1086_v56 = vld [vmem:[%s2578_s12] sm:$0x3] }
 0x598   :  { %1936 = vmatprep.subr.bf16.mxu0 %v2160_v6 }
 0x59b   :  { %1938 = vmatpush3.bf16.msra.mxu0 %v1937_v62  ;;  %v1072_v62 = vld [vmem:[#allocation7 + $0x90] sm:$0xff] }
 0x59c   :  { %1939 = vmatprep.subr.bf16.mxu0 %v2160_v6  ;;  %v1984_v1 = vpack.c.bf16 %v1072_v62, %v1070_v61  ;;  %v1169_v61 = vld [vmem:[%s2579_s13] sm:$0xff] }
 0x59f   :  { %1941 = vmatpush3.bf16.msra.mxu0 %v1940_v4  ;;  %v1074_v4 = vld [vmem:[#allocation7 + $0xa0] sm:$0xff] }
 0x5a0   :  { %1967 = vmatprep.subr.bf16.mxu0 %v1966_v37  ;;  %v1185_v37 = vld [vmem:[#allocation9 + $0x48] sm:$0xff] }
 0x5a1   :  { %v2011_v38 = vpack.c.bf16 %v1185_v37, %v1184_v36 }
 0x655   :  { %v767_v63 = vpop.f32.mrb[8].mxu0 }
 0x656   :  { %v1614_v0 = vpop.f32.mrb[9].mxu0  ;;  %1648 = vmatmul.mubr.f32.vlgmr.msra.gmra.mrb[4].mxu1 %v767_v63  ;;  %v1075_v63 = vld [vmem:[#allocation7 + $0xa8] sm:$0xff] }
 0x657   :  { %1717 = vmatprep.mubr.msk.f32.mxu1 %vm2161_vm7, %v2162_v7  ;;  %1944 = vmatpush3.bf16.msra.mxu1 %v1943_v9  ;;  %v1077_v0 = vld [vmem:[#allocation7 + $0xb8] sm:$0xff]  ;;  %v1988_v9 = vpack.c.bf16 %v1076_v5, %v1074_v4  ;;  %v2163_v4 = vmov 1.0  }
 0x658   :  { %1945 = vmatprep.subr.bf16.mxu1 %v2160_v6  ;;  %v1986_v3 = vpack.c.bf16 %v1077_v0, %v1075_v63  ;;  %v1170_v63 = vld [vmem:[%s2579_s13 + $0x8] sm:$0xff] }
 0x65b   :  { %1947 = vmatpush3.bf16.msra.mxu1 %v1946_v11  ;;  %v1078_v11 = vld [vmem:[#allocation7 + $0xc0] sm:$0xff] }
 0x65c   :  { %1948 = vmatprep.subr.bf16.mxu1 %v2160_v6  ;;  %v1992_v14 = vpack.c.bf16 %v1080_v13, %v1078_v11 }
 0x65f   :  { %1950 = vmatpush3.bf16.msra.mxu1 %v1949_v15  ;;  %v1298_v15 = vld [vmem:[%s2576_s10] ss:$0 sm:$0xff] }
 0x660   :  { %1951 = vmatprep.subr.bf16.mxu1 %v2160_v6 }
 0x663   :  { %1953 = vmatpush3.bf16.msra.mxu1 %v1952_v18 }
 0x664   :  { %1954 = vmatprep.subr.bf16.mxu1 %v2160_v6 }
 0x667   :  { %1956 = vmatpush3.bf16.msra.mxu1 %v1955_v21  ;;  %v1085_v21 = vld [vmem:[#allocation7 + $0xf8] sm:$0xff] }
 0x668   :  { %1957 = vmatprep.subr.bf16.mxu1 %v2160_v6  ;;  %v1994_v22 = vpack.c.bf16 %v1085_v21, %v1083_v20 }
 0x66b   :  { %1959 = vmatpush3.bf16.msra.mxu1 %v1958_v12  ;;  %v1084_v12 = vld [vmem:[#allocation7 + $0xf0] sm:$0xff] }
 0x66c   :  { %1960 = vmatprep.subr.bf16.mxu1 %v2160_v6  ;;  %v1996_v24 = vpack.c.bf16 %v1084_v12, %v1082_v23 }
 0x66f   :  { %1962 = vmatpush3.bf16.msra.mxu1 %v1961_v26  ;;  %v1177_v26 = vld [vmem:[#allocation9 + $0x8] sm:$0xff] }
 0x670   :  { %1963 = vmatprep.subr.bf16.mxu1 %v2160_v6 }
 0x673   :  { %1965 = vmatpush3.bf16.msra.mxu1 %v1964_v33  ;;  %v1182_v33 = vld [vmem:[#allocation9 + $0x30] sm:$0xff] }
 0x674   :  { %1998 = vmatprep.subr.bf16.mxu1 %v2160_v6  ;;  %v2008_v35 = vpack.c.bf16 %v1183_v34, %v1182_v33 }
 0x729   :  { %v860_v28 = vpop.f32.mrb[4].mxu1 }
 0x72a   :  { %v861_v29 = vadd.f32 %v1297_v27, %v860_v28  ;;  %v1649_v30 = vpop.f32.mrb[5].mxu1  ;;  %v1178_v27 = vld [vmem:[#allocation9 + $0x10] sm:$0xff]  ;;  %v1999_v28 = vpack.c.bf16 %v1177_v26, %v1176_v25 }
 0x72c   :  { %1683 = vmatmul.mubr.f32.vlgmr.msra.gmra.mrb[10].mxu0 %v861_v29  ;;  %v1179_v29 = vld [vmem:[#allocation9 + $0x18] sm:$0xff] }
 0x72d   :  { %1162 = vmatprep.mubr.f32.mxu0 %v2162_v7  ;;  %1969 = vmatpush1.bf16.msra.mxu0 %v1968_v41  ;;  %v2002_v30 = vpack.c.bf16 %v1179_v29, %v1178_v27  ;;  %v2014_v41 = vpack.c.bf16 %v1187_v40, %v1186_v39 }
 0x72e   :  { %1971 = vmatprep.subr.bf16.mxu0 %v1970_v42  ;;  %v1300_v42 = vld [vmem:[%s2576_s10 + $0x1] ss:$0 sm:$0xff] }
 0x731   :  { %1973 = vmatpush1.bf16.msra.mxu0 %v1972_v47  ;;  %v1188_v47 = vld [vmem:[#allocation9 + $0x60] sm:$0xff] }
 0x732   :  { %1975 = vmatprep.subr.bf16.mxu0 %v1974_v48  ;;  %v1189_v48 = vld [vmem:[#allocation9 + $0x68] sm:$0xff] }
 0x733   :  { %v2017_v49 = vpack.c.bf16 %v1189_v48, %v1188_v47 }
 0x735   :  { %1977 = vmatpush1.bf16.msra.mxu0 %v1976_v53  ;;  %v1088_v53 = vlaneseq }
 0x736   :  { %1979 = vmatprep.subr.bf16.mxu0 %v1978_v54 }
 0x737   :  { %v1089_v54 = vshrl.u32 %v1088_v53, 7 }
 0x739   :  { %1981 = vmatpush1.bf16.msra.mxu0 %v1980_v59  ;;  %v1090_v55 = vsub.s32 0, %v1089_v54  ;;  %v1094_v57 = vsub.s32 1, %v1089_v54 }
 0x73a   :  { %1983 = vmatprep.subr.bf16.mxu0 %v1982_v60 }
 0x73b   :  { %v1091_v58 = vrot.slane %v1086_v56, %v1090_v55  ;;  %v1095_v59 = vrot.slane %v1086_v56, %v1094_v57 }
 0x73d   :  { %1985 = vmatpush1.bf16.msra.mxu0 %v1984_v1 }
 0x73e   :  { %1987 = vmatprep.subr.bf16.mxu0 %v1986_v3 }
 0x741   :  { %1989 = vmatpush1.bf16.msra.mxu0 %v1988_v9 }
 0x742   :  { %1991 = vmatprep.subr.bf16.mxu0 %v1990_v10 }
 0x745   :  { %1993 = vmatpush1.bf16.msra.mxu0 %v1992_v14 }
 0x746   :  { %1995 = vmatprep.subr.bf16.mxu0 %v1994_v22 }
 0x749   :  { %1997 = vmatpush1.bf16.msra.mxu0 %v1996_v24 }
 0x7ff   :  { %v953_v16 = vpop.f32.mrb[10].mxu0 }
 0x800   :  { %v954_v17 = vadd.f32 %v1298_v15, %v953_v16  ;;  %v1684_v18 = vpop.f32.mrb[11].mxu0 }
 0x802   :  { %v957_v19 = vmax.f32 %v954_v17, 0.0 }
 0x804   :  { %1718 = vmatmul.mubr.f32.vlgmr.msra.gmra.mrb[6].mxu1 %v957_v19 }
 0x805   :  { %1752 = vmatprep.mubr.msk.f32.mxu1 %vm2161_vm7, %v2162_v7  ;;  %2000 = vmatpush3.bf16.msra.mxu1 %v1999_v28  ;;  %v2005_v7 = vpack.c.bf16 %v1181_v32, %v1180_v31 }
 0x806   :  { %2001 = vmatprep.subr.bf16.mxu1 %v2160_v6 }
 0x809   :  { %2003 = vmatpush3.bf16.msra.mxu1 %v2002_v30 }
 0x80a   :  { %2004 = vmatprep.subr.bf16.mxu1 %v2160_v6 }
 0x80d   :  { %2006 = vmatpush3.bf16.msra.mxu1 %v2005_v7 }
 0x80e   :  { %2007 = vmatprep.subr.bf16.mxu1 %v2160_v6 }
 0x811   :  { %2009 = vmatpush3.bf16.msra.mxu1 %v2008_v35 }
 0x812   :  { %2010 = vmatprep.subr.bf16.mxu1 %v2160_v6 }
 0x815   :  { %2012 = vmatpush3.bf16.msra.mxu1 %v2011_v38 }
 0x816   :  { %2013 = vmatprep.subr.bf16.mxu1 %v2160_v6 }
 0x819   :  { %2015 = vmatpush3.bf16.msra.mxu1 %v2014_v41 }
 0x81a   :  { %2016 = vmatprep.subr.bf16.mxu1 %v2160_v6 }
 0x81d   :  { %2018 = vmatpush3.bf16.msra.mxu1 %v2017_v49 }
 0x81e   :  { %2019 = vmatprep.subr.bf16.mxu1 %v2160_v6 }
 0x821   :  { %2021 = vmatpush3.bf16.msra.mxu1 %v2020_v52 }
 0x8d7   :  { %v1049_v43 = vpop.f32.mrb[6].mxu1 }
 0x8d8   :  { %v1050_v44 = vadd.f32 %v1300_v42, %v1049_v43  ;;  %v1719_v45 = vpop.f32.mrb[7].mxu1 }
 0x8da   :  { %v1053_v46 = vmax.f32 %v1050_v44, 0.0 }
 0x8dc   :  { %1163 = vmatmul.mubr.f32.vlgmr.msra.gmra.mrb[12].mxu0 %v1053_v46 }
 0x9af   :  { %v1164_v60 = vpop.f32.mrb[12].mxu0 }
 0x9b0   :  { %v1165_v6 = vadd.f32 %v1164_v60, %v1091_v58  ;;  %v1166_v62 = vpop.f32.mrb[13].mxu0 }
 0x9b1   :  { %v1167_v0 = vadd.f32 %v1166_v62, %v1095_v59 }
 0x9b2   :  { %v1171_v1 = vadd.f32 %v1169_v61, %v1165_v6 }
 0x9b3   :  { %v1172_v3 = vadd.f32 %v1170_v63, %v1167_v0 }
 0x9b5   :  { %vm1173_vm10 = vcmp.ge.f32.partialorder %v1171_v1, %v1172_v3 }
 0x9b6   :  { %1753 = vmatmul.mubr.msk.f32.vlgmr.msra.gmra.mrb[8].mxu1 %vm1173_vm10, %v2163_v4 }
 0xa89   :  { %v1258_v5 = vpop.f32.mrb[8].mxu1 }
 0xa8a   :  { %1262 = vst [vmem:[%s2581_s15] sm:$0xff] %v1258_v5  ;;  %v1754_v8 = vpop.f32.mrb[9].mxu1 }
 0xa8b   :  { %1267 = vsyncpa [#allocation3], 1 }
 0xa8c   :  { %1268 = vsyncpa [#allocation5], 1 }
 0xa8d   :  { %1269 = vsyncpa [#allocation8], 1 }

</bundles_post_ra>
